<compile_context>
chip_gen: v5e
topology: v5e:2x2
jax: 0.10.0
libtpu: 0.0.40
codegen_flags: <defaults>
</compile_context>

<pallas_src>
import jax
import jax.numpy as jnp
from jax.experimental import pallas as pl
from jax.experimental.pallas import tpu as pltpu

NUMBER_OF_CLASSES = 16
NUMBER_OF_FEATURES = 5
HIDDEN = 10

LANES = 128
F_PAD = 8                      # features padded to one sublane group (K of fc0)
H_PAD = 16                     # hidden padded to 16 sublanes (K of fc1 / W1 rows)
W0_OFF = 0                     # slab rows [0, 8)   : W0 zero-padded to (8, 128)
W1_OFF = F_PAD                 # slab rows [8, 24)  : W1 zero-padded to (16, 128)
B0_ROW = W1_OFF + H_PAD        # slab row 24        : b0 zero-padded to (1, 128)
B1_ROW = B0_ROW + 1            # slab row 25        : b1 zero-padded to (1, 128)
SLAB_ROWS = 32                 # multiple of 8 sublanes -> 16 KiB slab

MAX_TILE = 1024                # batch-tile cap; VMEM footprint stays trivial
SMALL_BATCH_XLA_CUTOFF = 256   # below this, custom-call overhead > whole MLP


def _round_up(n, m):
    return ((n + m - 1) // m) * m


def _mlp_kernel(x_ref, slab_ref, o_ref):
    x = x_ref[...]                                   # (TB, 8)   padded features
    w0 = slab_ref[W0_OFF:W0_OFF + F_PAD, :]          # (8, 128)  zero-padded
    w1 = slab_ref[W1_OFF:W1_OFF + H_PAD, :]          # (16, 128) zero-padded
    b0 = slab_ref[B0_ROW:B0_ROW + 1, :]              # (1, 128)  zero-padded
    b1 = slab_ref[B1_ROW:B1_ROW + 1, :]              # (1, 128)  zero-padded

    # fc0 + relu : lanes >= HIDDEN of h are exactly 0 (w0/b0 zero-padded)
    h = jnp.maximum(jnp.dot(x, w0, preferred_element_type=jnp.float32) + b0, 0.0)

    # fc1 + relu : contract only the first 16 lanes of h against the (16,128) W1
    # (rows 10..15 of W1 and lanes 10..15 of h are both zero -> exact)
    h16 = h[:, :H_PAD]                               # (TB, 16)
    z = jnp.maximum(jnp.dot(h16, w1, preferred_element_type=jnp.float32) + b1, 0.0)

    # log_softmax over the 16 real classes (mask the 112 padded lanes of z)
    lane = jax.lax.broadcasted_iota(jnp.int32, z.shape, 1)
    valid = lane < NUMBER_OF_CLASSES
    zm = jnp.where(valid, z, -jnp.inf)
    m = jnp.max(zm, axis=-1, keepdims=True)
    e = jnp.where(valid, jnp.exp(z - m), 0.0)
    lse = jnp.log(jnp.sum(e, axis=-1, keepdims=True))
    lp = z - m - lse

    # Narrow (TB, 16) store: only real classes go back to HBM (8x less writeback).
    o_ref[...] = lp[:, :NUMBER_OF_CLASSES]


def pack_params(w0, b0, w1, b1):
    """Pack (in,out)-layout weights + biases into one zero-padded (32,128) f32 slab."""
    slab = jnp.zeros((SLAB_ROWS, LANES), jnp.float32)
    slab = slab.at[W0_OFF:W0_OFF + NUMBER_OF_FEATURES, 0:HIDDEN].set(w0)
    slab = slab.at[W1_OFF:W1_OFF + HIDDEN, 0:NUMBER_OF_CLASSES].set(w1)
    slab = slab.at[B0_ROW, 0:HIDDEN].set(b0)
    slab = slab.at[B1_ROW, 0:NUMBER_OF_CLASSES].set(b1)
    return slab


def _choose_tile(batch):
    """Biggest tile <= MAX_TILE that still yields >= 2 grid steps when possible."""
    b8 = _round_up(max(batch, 1), 8)
    tb = _round_up((b8 + 1) // 2, 8)       # aim for >= 2 steps (v7x: 2 TensorCores)
    return max(8, min(tb, MAX_TILE))


def _xla_forward(xb, w0, b0, w1, b1):
    """Plain-XLA path (reference and small-batch fast path)."""
    h = jnp.maximum(xb @ w0 + b0, 0.0)
    z = jnp.maximum(h @ w1 + b1, 0.0)
    return jax.nn.log_softmax(z, axis=-1)


def _pallas_forward(xb, slab):
    B = xb.shape[0]
    TB = _choose_tile(B)
    Bp = _round_up(B, TB)

    # Pad batch up to a tile multiple and features to 8 (aligned K for the MXU).
    x_pad = jnp.pad(xb.astype(jnp.float32),
                    ((0, Bp - B), (0, F_PAD - NUMBER_OF_FEATURES)))

    out = pl.pallas_call(
        _mlp_kernel,
        out_shape=jax.ShapeDtypeStruct((Bp, NUMBER_OF_CLASSES), jnp.float32),
        grid=(Bp // TB,),
        in_specs=[
            pl.BlockSpec((TB, F_PAD), lambda i: (i, 0)),
            # Constant block index -> single 16 KiB slab fetch reused by every step.
            pl.BlockSpec((SLAB_ROWS, LANES), lambda i: (0, 0)),
        ],
        out_specs=pl.BlockSpec((TB, NUMBER_OF_CLASSES), lambda i: (i, 0)),
        compiler_params=pltpu.CompilerParams(
            dimension_semantics=("parallel",)),   # batch tiles split across TCs (v7x)
    )(x_pad, slab)
    return out[:B]


def batched_forward(xb, params, *, use_pallas=None):
    """xb: (B, NUMBER_OF_FEATURES) -> (B, NUMBER_OF_CLASSES) log-probs."""
    w0, b0, w1, b1 = params
    xb = jnp.asarray(xb, jnp.float32)
    B = xb.shape[0]
    if use_pallas is None:
        use_pallas = B > SMALL_BATCH_XLA_CUTOFF
    if not use_pallas:
        # Tiny batch: custom-call + pipeline overhead exceeds the whole 5->10->16 MLP.
        return _xla_forward(xb, w0, b0, w1, b1)
    return _pallas_forward(xb, pack_params(w0, b0, w1, b1))


def model_forward(x, params):
    """Faithful to PyTorch forward: x.view(1, 5) -> fc0 -> relu -> fc1 -> relu -> log_softmax."""
    x2 = jnp.reshape(x, (1, NUMBER_OF_FEATURES)).astype(jnp.float32)
    return batched_forward(x2, params)      # B=1 -> XLA fast path per perf feedback


def init_params(key):
    """PyTorch-style uniform init; weights stored as (in, out), biases 1-D."""
    k0, k1, k2, k3 = jax.random.split(key, 4)
    bound0 = 1.0 / (NUMBER_OF_FEATURES ** 0.5)
    bound1 = 1.0 / (HIDDEN ** 0.5)
    w0 = jax.random.uniform(k0, (NUMBER_OF_FEATURES, HIDDEN), jnp.float32,
                            minval=-bound0, maxval=bound0)
    b0 = jax.random.uniform(k1, (HIDDEN,), jnp.float32,
                            minval=-bound0, maxval=bound0)
    w1 = jax.random.uniform(k2, (HIDDEN, NUMBER_OF_CLASSES), jnp.float32,
                            minval=-bound1, maxval=bound1)
    b1 = jax.random.uniform(k3, (NUMBER_OF_CLASSES,), jnp.float32,
                            minval=-bound1, maxval=bound1)
    return w0, b0, w1, b1


if __name__ == "__main__":
    key = jax.random.PRNGKey(0)
    k_params, k_x1, k_big, k_ragged = jax.random.split(key, 4)

    params = init_params(k_params)
    w0, b0, w1, b1 = params

    # --- single-sample path (matches PyTorch Model.forward semantics; XLA fast path) ---
    x = jax.random.normal(k_x1, (NUMBER_OF_FEATURES,), jnp.float32)
    out1 = jax.block_until_ready(model_forward(x, params))
    ref1 = _xla_forward(x.reshape(1, NUMBER_OF_FEATURES), w0, b0, w1, b1)
    assert out1.shape == (1, NUMBER_OF_CLASSES)
    assert bool(jnp.allclose(out1, ref1, atol=1e-4, rtol=1e-4))
    assert abs(float(jnp.sum(jnp.exp(out1))) - 1.0) < 1e-3

    # --- large-batch Pallas path: TB=512, grid=(2,) -> both v7x TensorCores busy ---
    B = 1024
    xb = jax.random.normal(k_big, (B, NUMBER_OF_FEATURES), jnp.float32)
    outb = jax.block_until_ready(batched_forward(xb, params))
    refb = _xla_forward(xb, w0, b0, w1, b1)
    assert outb.shape == (B, NUMBER_OF_CLASSES)
    assert bool(jnp.allclose(outb, refb, atol=1e-4, rtol=1e-4))
    assert bool(jnp.allclose(jnp.sum(jnp.exp(outb), axis=-1),
                             jnp.ones((B,)), atol=1e-3))

    # --- ragged batch forced through the Pallas path (padding / tiling correctness) ---
    Br = 200
    xr = jax.random.normal(k_ragged, (Br, NUMBER_OF_FEATURES), jnp.float32)
    outr = jax.block_until_ready(batched_forward(xr, params, use_pallas=True))
    refr = _xla_forward(xr, w0, b0, w1, b1)
    assert outr.shape == (Br, NUMBER_OF_CLASSES)
    assert bool(jnp.allclose(outr, refr, atol=1e-4, rtol=1e-4))

    print("KERNEL_OK")
</pallas_src>

<mosaic_0001>
module attributes {stable_mosaic.version = 11 : i64} {
  func.func @_mlp_kernel(%arg0: i32, %arg1: memref<512x8xf32, #tpu.memory_space<vmem>>, %arg2: memref<32x128xf32, #tpu.memory_space<vmem>>, %arg3: memref<512x16xf32, #tpu.memory_space<vmem>>) attributes {dimension_semantics = [#tpu.dimension_semantics<parallel>], iteration_bounds = array<i64: 2>, scalar_prefetch = 0 : i64, scratch_operands = 0 : i64, tpu.core_type = #tpu.core_type<tc>, window_params = [{transform_indices = @transform_0, window_bounds = array<i64: 512, 8>}, {pipeline_mode = #tpu.pipeline_mode<synchronous>, transform_indices = @transform_1, window_bounds = array<i64: 32, 128>}, {transform_indices = @transform_2, window_bounds = array<i64: 512, 16>}]} {
    %c0 = arith.constant 0 : index
    %c0_0 = arith.constant 0 : index
    %0 = vector.load %arg1[%c0, %c0_0] : memref<512x8xf32, #tpu.memory_space<vmem>>, vector<512x8xf32>
    %c0_1 = arith.constant 0 : index
    %c0_2 = arith.constant 0 : index
    %1 = vector.load %arg2[%c0_1, %c0_2] : memref<32x128xf32, #tpu.memory_space<vmem>>, vector<8x128xf32>
    %c8 = arith.constant 8 : index
    %c0_3 = arith.constant 0 : index
    %2 = vector.load %arg2[%c8, %c0_3] : memref<32x128xf32, #tpu.memory_space<vmem>>, vector<16x128xf32>
    %c24 = arith.constant 24 : index
    %c0_4 = arith.constant 0 : index
    %3 = vector.load %arg2[%c24, %c0_4] : memref<32x128xf32, #tpu.memory_space<vmem>>, vector<1x128xf32>
    %c25 = arith.constant 25 : index
    %c0_5 = arith.constant 0 : index
    %4 = vector.load %arg2[%c25, %c0_5] : memref<32x128xf32, #tpu.memory_space<vmem>>, vector<1x128xf32>
    %cst = arith.constant dense<0.000000e+00> : vector<512x128xf32>
    %5 = tpu.matmul %0, %1, %cst {dimension_numbers = #tpu.dot_dimension_numbers<[1], [0], [0], [1], [0, 0, 1, 1], [], []>} : vector<512x8xf32>, vector<8x128xf32>, vector<512x128xf32> -> vector<512x128xf32>
    %6 = vector.broadcast %3 : vector<1x128xf32> to vector<512x128xf32>
    %7 = arith.addf %5, %6 : vector<512x128xf32>
    %cst_6 = arith.constant 0.000000e+00 : f32
    %8 = vector.broadcast %cst_6 : f32 to vector<512x128xf32>
    %9 = arith.maximumf %7, %8 : vector<512x128xf32>
    %10 = vector.extract_strided_slice %9 {offsets = [0, 0], sizes = [512, 16], strides = [1, 1]} : vector<512x128xf32> to vector<512x16xf32>
    %cst_7 = arith.constant dense<0.000000e+00> : vector<512x128xf32>
    %11 = tpu.matmul %10, %2, %cst_7 {dimension_numbers = #tpu.dot_dimension_numbers<[1], [0], [0], [1], [0, 0, 1, 1], [], []>} : vector<512x16xf32>, vector<16x128xf32>, vector<512x128xf32> -> vector<512x128xf32>
    %12 = vector.broadcast %4 : vector<1x128xf32> to vector<512x128xf32>
    %13 = arith.addf %11, %12 : vector<512x128xf32>
    %cst_8 = arith.constant 0.000000e+00 : f32
    %14 = vector.broadcast %cst_8 : f32 to vector<512x128xf32>
    %15 = arith.maximumf %13, %14 : vector<512x128xf32>
    %16 = tpu.iota {dimensions = array<i32: 1>} : vector<512x128xi32>
    %c16_i32 = arith.constant 16 : i32
    %17 = vector.broadcast %c16_i32 : i32 to vector<512x128xi32>
    %18 = arith.cmpi slt, %16, %17 : vector<512x128xi32>
    %cst_9 = arith.constant 0xFF800000 : f32
    %19 = vector.broadcast %cst_9 : f32 to vector<512x128xf32>
    %20 = arith.select %18, %15, %19 : vector<512x128xi1>, vector<512x128xf32>
    %cst_10 = arith.constant dense<0xFF800000> : vector<512xf32>
    %21 = vector.multi_reduction <maximumf>, %20, %cst_10 [1] : vector<512x128xf32> to vector<512xf32>
    %22 = vector.shape_cast %21 : vector<512xf32> to vector<512x1xf32>
    %23 = vector.broadcast %22 : vector<512x1xf32> to vector<512x128xf32>
    %24 = arith.subf %15, %23 : vector<512x128xf32>
    %25 = math.exp %24 : vector<512x128xf32>
    %cst_11 = arith.constant 0.000000e+00 : f32
    %26 = vector.broadcast %cst_11 : f32 to vector<512x128xf32>
    %27 = arith.select %18, %25, %26 : vector<512x128xi1>, vector<512x128xf32>
    %cst_12 = arith.constant dense<0.000000e+00> : vector<512xf32>
    %28 = vector.multi_reduction <add>, %27, %cst_12 [1] : vector<512x128xf32> to vector<512xf32>
    %29 = vector.shape_cast %28 : vector<512xf32> to vector<512x1xf32>
    %30 = math.log %29 : vector<512x1xf32>
    %31 = vector.broadcast %22 : vector<512x1xf32> to vector<512x128xf32>
    %32 = arith.subf %15, %31 : vector<512x128xf32>
    %33 = vector.broadcast %30 : vector<512x1xf32> to vector<512x128xf32>
    %34 = arith.subf %32, %33 : vector<512x128xf32>
    %35 = vector.extract_strided_slice %34 {offsets = [0, 0], sizes = [512, 16], strides = [1, 1]} : vector<512x128xf32> to vector<512x16xf32>
    %c0_13 = arith.constant 0 : index
    %c0_14 = arith.constant 0 : index
    %36 = vector.load %arg3[%c0_13, %c0_14] : memref<512x16xf32, #tpu.memory_space<vmem>>, vector<512x16xf32>
    tpu.vector_store %arg3[%c0_13, %c0_14], %35 {strides = array<i32>} : memref<512x16xf32, #tpu.memory_space<vmem>>, vector<512x16xf32>,
    return
  }
  func.func @transform_0(%arg0: i32) -> (i32, i32) {
    %c0_i32 = arith.constant 0 : i32
    %c0_i32_0 = arith.constant 0 : i32
    return %arg0, %c0_i32 : i32, i32
  }
  func.func @transform_1(%arg0: i32) -> (i32, i32) {
    %c0_i32 = arith.constant 0 : i32
    %c0_i32_0 = arith.constant 0 : i32
    %c0_i32_1 = arith.constant 0 : i32
    return %c0_i32, %c0_i32_0 : i32, i32
  }
  func.func @transform_2(%arg0: i32) -> (i32, i32) {
    %c0_i32 = arith.constant 0 : i32
    %c0_i32_0 = arith.constant 0 : i32
    return %arg0, %c0_i32 : i32, i32
  }
}

</mosaic_0001>

<bundles_post_ra>
// kernel: tpu_custom_call.1
= control target key start
LH: loop header
LB: loop body
LE: loop exit
PB: predicated region body
PF: predicated region fallthrough
CT: control target
= control target key end

     0   :  { %s2475_s9 = smov 0   ;;  %s3979_s0 = inlined_call_operand.vmem [shape: f32[1024,8], index: 0, kind: input, shape index: {}]   ;;  %s3980_s1 = inlined_call_operand.vmem [shape: f32[32,128], index: 1, kind: input, shape index: {}]   ;;  %s3981_s2 = inlined_call_operand.vmem [shape: f32[1024,16], index: 2, kind: output, shape index: {}]  }
   0x1 LB: > { %s2041_s10 = sadd.s32 4294967295, %s2458_s9   ;;  %p2045_p0 = scmp.ge.s32.totalorder %s2458_s9, 1  ;;  %s2458_s9 = sphi %s2475_s9, %s12_s9  }
   0x2   : > { %p113_p1 = scmp.lt.s32.totalorder %s2458_s9, 3 }
   0x4   : > { %p114_p2 = pnand %p2045_p0, %p113_p1 }
   0x5   : > { %s2046_s13 = sshll.u32 (!%p114_p2), %s2041_s10, 6 }
   0x6   : > { %117 = sbr.rel (%p114_p2) target bundleno = 1042 (0x412), region = 28  ;;  %p136_p3 = scmp.lt.s32.totalorder (!%p114_p2), %s2046_s13, 127 }
   0xb   : > { %v211_v0 = vld [vmem:[%s3980_s1] sm:$0xff]  ;;  %s3987_s13 = smov (!%p136_p3, %s2046_s13), 127  ;;  %vm217_vm0 = vcmask 64512   ;;  %v213_v14 = vld [vmem:[%s3980_s1 + $0x10] sm:$0xff]  ;;  %v212_v15 = vld [vmem:[%s3980_s1 + $0x8] sm:$0xff]  ;;  %vm684_vm1 = vcmask 130048  }
   0xc   : > { %425 = vmatpush.msra.mxu0 %v211_v0  ;;  %2180 = vmatpush.msra.mxu3 %v211_v0  ;;  %s2047_s14 = sshll.u32 %s3987_s13, 3  ;;  %v2537_v19 = vld [vmem:[%s3980_s1 + $0x18] ss:$0 sm:$0xff] }
   0xd   : > { %s2494_s17 = scalar_lea.vmem %s3979_s0, %s2047_s14  ;;  %891 = vmatpush.msra.mxu1 %v213_v14  ;;  %2181 = vmatpush.msra.mxu2 %v213_v14  ;;  %s3166_s30 = scalar_lea.vmem %s3981_s2, %s2047_s14 }
   0xe   : > { %v147_v1 = vld [vmem:[%s2494_s17] sm:$0xff]  ;;  %v148_v2 = vld [vmem:[%s2494_s17 + $0x8] sm:$0xff]  ;;  %v149_v3 = vld [vmem:[%s2494_s17 + $0x10] sm:$0xff] }
   0xf   : > { %2050 = vmatmul.msk.f32.vlgmr.msra.gmra.mxu0 %vm217_vm0, %v147_v1  ;;  %v150_v4 = vld [vmem:[%s2494_s17 + $0x18] sm:$0xff]  ;;  %v151_v5 = vld [vmem:[%s2494_s17 + $0x20] sm:$0xff]  ;;  %v152_v6 = vld [vmem:[%s2494_s17 + $0x28] sm:$0xff]  ;;  %892 = vmatpush.msra.mxu1 %v212_v15 }
  0x10   : > { %v153_v7 = vld [vmem:[%s2494_s17 + $0x30] sm:$0xff]  ;;  %v154_v8 = vld [vmem:[%s2494_s17 + $0x38] sm:$0xff]  ;;  %v155_v9 = vld [vmem:[%s2494_s17 + $0x40] sm:$0xff]  ;;  %2182 = vmatpush.msra.mxu2 %v212_v15 }
  0x11   : > { %v156_v10 = vld [vmem:[%s2494_s17 + $0x48] sm:$0xff]  ;;  %v157_v11 = vld [vmem:[%s2494_s17 + $0x50] sm:$0xff]  ;;  %v158_v12 = vld [vmem:[%s2494_s17 + $0x58] sm:$0xff] }
  0x12   : > { %v159_v13 = vld [vmem:[%s2494_s17 + $0x60] sm:$0xff]  ;;  %v160_v16 = vld [vmem:[%s2494_s17 + $0x68] sm:$0xff]  ;;  %v161_v17 = vld [vmem:[%s2494_s17 + $0x70] sm:$0xff] }
  0x13   : > { %v162_v18 = vld [vmem:[%s2494_s17 + $0x78] sm:$0xff]  ;;  %v163_v21 = vld [vmem:[%s2494_s17 + $0x80] sm:$0xff]  ;;  %v164_v25 = vld [vmem:[%s2494_s17 + $0x88] sm:$0xff] }
  0x14   : > { %v165_v29 = vld [vmem:[%s2494_s17 + $0x90] sm:$0xff]  ;;  %v166_v33 = vld [vmem:[%s2494_s17 + $0x98] sm:$0xff]  ;;  %v167_v37 = vld [vmem:[%s2494_s17 + $0xa0] sm:$0xff] }
  0x15   : > { %v168_v41 = vld [vmem:[%s2494_s17 + $0xa8] sm:$0xff]  ;;  %v169_v45 = vld [vmem:[%s2494_s17 + $0xb0] sm:$0xff]  ;;  %v170_v49 = vld [vmem:[%s2494_s17 + $0xb8] sm:$0xff] }
  0x16   : > { %v171_v53 = vld [vmem:[%s2494_s17 + $0xc0] sm:$0xff]  ;;  %v172_v57 = vld [vmem:[%s2494_s17 + $0xc8] sm:$0xff]  ;;  %v173_v61 = vld [vmem:[%s2494_s17 + $0xd0] sm:$0xff] }
  0x17   : > { %2051 = vmatmul.msk.f32.gmra.mxu0 %vm217_vm0, %v148_v2  ;;  %v174_v1 = vld [vmem:[%s2494_s17 + $0xd8] sm:$0xff]  ;;  %v177_v15 = vld [vmem:[%s2494_s17 + $0xf0] sm:$0xff] }
  0x1f   : > { %2052 = vmatmul.msk.f32.gmra.mxu0 %vm217_vm0, %v149_v3 }
  0x27   : > { %2053 = vmatmul.msk.f32.gmra.mxu0 %vm217_vm0, %v150_v4 }
  0x2f   : > { %2054 = vmatmul.msk.f32.gmra.mxu0 %vm217_vm0, %v151_v5  ;;  %v175_v5 = vld [vmem:[%s2494_s17 + $0xe0] sm:$0xff] }
  0x37   : > { %2055 = vmatmul.msk.f32.gmra.mxu0 %vm217_vm0, %v152_v6 }
  0x3f   : > { %2056 = vmatmul.msk.f32.gmra.mxu0 %vm217_vm0, %v153_v7 }
  0x47   : > { %2057 = vmatmul.msk.f32.gmra.mxu0 %vm217_vm0, %v154_v8  ;;  %v180_v8 = vld [vmem:[%s2494_s17 + $0x108] sm:$0xff] }
  0x48   : > { %2083 = vmatmul.msk.f32.vlgmr.msra.gmra.mxu3 %vm217_vm0, %v180_v8 }
  0x4f   : > { %2058 = vmatmul.msk.f32.gmra.mxu0 %vm217_vm0, %v155_v9 }
  0x57   : > { %2059 = vmatmul.msk.f32.gmra.mxu0 %vm217_vm0, %v156_v10  ;;  %v176_v10 = vld [vmem:[%s2494_s17 + $0xe8] sm:$0xff] }
  0x5f   : > { %2060 = vmatmul.msk.f32.gmra.mxu0 %vm217_vm0, %v157_v11 }
  0x67   : > { %2061 = vmatmul.msk.f32.gmra.mxu0 %vm217_vm0, %v158_v12 }
  0x6f   : > { %2062 = vmatmul.msk.f32.gmra.mxu0 %vm217_vm0, %v159_v13  ;;  %v181_v13 = vld [vmem:[%s2494_s17 + $0x110] sm:$0xff] }
  0x70   : > { %2084 = vmatmul.msk.f32.gmra.mxu3 %vm217_vm0, %v181_v13 }
  0x77   : > { %2063 = vmatmul.msk.f32.gmra.mxu0 %vm217_vm0, %v160_v16 }
  0x7f   : > { %2064 = vmatmul.msk.f32.gmra.mxu0 %vm217_vm0, %v161_v17 }
  0x87   : > { %2065 = vmatmul.msk.f32.gmra.mxu0 %vm217_vm0, %v162_v18  ;;  %v182_v18 = vld [vmem:[%s2494_s17 + $0x118] sm:$0xff] }
  0x88   : > { %2085 = vmatmul.msk.f32.gmra.mxu3 %vm217_vm0, %v182_v18  ;;  %v190_v18 = vld [vmem:[%s2494_s17 + $0x158] sm:$0xff] }
  0x8c   : > { %v427_v20 = vpop.f32.mrf.mxu0 }
  0x8d   : > { %v428_v22 = vadd.f32 %v2537_v19, %v427_v20 }
  0x8f   : > { %v619_v23 = vmax.f32 %v428_v22, 0.0  ;;  %2066 = vmatmul.msk.f32.gmra.mxu0 %vm217_vm0, %v163_v21  ;;  %v178_v21 = vld [vmem:[%s2494_s17 + $0xf8] sm:$0xff] }
  0x91   : > { %2114 = vmatmul.msk.f32.vlgmr.msra.gmra.mxu1 %vm684_vm1, %v619_v23 }
  0x94   : > { %v430_v24 = vpop.f32.mrf.mxu0 }
  0x95   : > { %v431_v26 = vadd.f32 %v2537_v19, %v430_v24  ;;  %v1150_v24 = vlaneseq }
  0x97   : > { %v620_v27 = vmax.f32 %v431_v26, 0.0  ;;  %2067 = vmatmul.msk.f32.gmra.mxu0 %vm217_vm0, %v164_v25  ;;  %v183_v25 = vld [vmem:[%s2494_s17 + $0x120] sm:$0xff]  ;;  %v2614_v26 = vld [vmem:[%s3980_s1 + $0x19] ss:$0 sm:$0xff] }
  0x98   : > { %2086 = vmatmul.msk.f32.gmra.mxu3 %vm217_vm0, %v183_v25 }
  0x99   : > { %2115 = vmatmul.msk.f32.gmra.mxu1 %vm684_vm1, %v620_v27 }
  0x9c   : > { %v433_v28 = vpop.f32.mrf.mxu0 }
  0x9d   : > { %v434_v30 = vadd.f32 %v2537_v19, %v433_v28  ;;  %v179_v28 = vld [vmem:[%s2494_s17 + $0x100] sm:$0xff] }
  0x9f   : > { %v621_v31 = vmax.f32 %v434_v30, 0.0  ;;  %2068 = vmatmul.msk.f32.gmra.mxu0 %vm217_vm0, %v165_v29  ;;  %v2617_v29 = vand.u32 127, %v1150_v24 }
  0xa1   : > { %2116 = vmatmul.msk.f32.gmra.mxu1 %vm684_vm1, %v621_v31  ;;  %vm1152_vm2 = vcmp.lt.s32.totalorder %v2617_v29, 16 }
  0xa4   : > { %v436_v32 = vpop.f32.mrf.mxu0 }
  0xa5   : > { %v437_v34 = vadd.f32 %v2537_v19, %v436_v32 }
  0xa7   : > { %v622_v35 = vmax.f32 %v437_v34, 0.0  ;;  %2069 = vmatmul.msk.f32.gmra.mxu0 %vm217_vm0, %v166_v33  ;;  %v184_v34 = vld [vmem:[%s2494_s17 + $0x128] sm:$0xff] }
  0xa8   : > { %2087 = vmatmul.msk.f32.gmra.mxu3 %vm217_vm0, %v184_v34 }
  0xa9   : > { %2117 = vmatmul.msk.f32.gmra.mxu1 %vm684_vm1, %v622_v35 }
  0xac   : > { %v439_v36 = vpop.f32.mrf.mxu0 }
  0xad   : > { %v440_v38 = vadd.f32 %v2537_v19, %v439_v36 }
  0xaf   : > { %v623_v39 = vmax.f32 %v440_v38, 0.0  ;;  %2070 = vmatmul.msk.f32.gmra.mxu0 %vm217_vm0, %v167_v37 }
  0xb1   : > { %2118 = vmatmul.msk.f32.gmra.mxu1 %vm684_vm1, %v623_v39 }
  0xb4   : > { %v442_v40 = vpop.f32.mrf.mxu0 }
  0xb5   : > { %v443_v42 = vadd.f32 %v2537_v19, %v442_v40 }
  0xb7   : > { %v624_v43 = vmax.f32 %v443_v42, 0.0  ;;  %2071 = vmatmul.msk.f32.gmra.mxu0 %vm217_vm0, %v168_v41  ;;  %v185_v42 = vld [vmem:[%s2494_s17 + $0x130] sm:$0xff] }
  0xb8   : > { %2088 = vmatmul.msk.f32.gmra.mxu3 %vm217_vm0, %v185_v42 }
  0xb9   : > { %2119 = vmatmul.msk.f32.gmra.mxu1 %vm684_vm1, %v624_v43 }
  0xbc   : > { %v445_v44 = vpop.f32.mrf.mxu0 }
  0xbd   : > { %v446_v46 = vadd.f32 %v2537_v19, %v445_v44 }
  0xbf   : > { %v625_v47 = vmax.f32 %v446_v46, 0.0  ;;  %2072 = vmatmul.msk.f32.gmra.mxu0 %vm217_vm0, %v169_v45 }
  0xc1   : > { %2120 = vmatmul.msk.f32.gmra.mxu1 %vm684_vm1, %v625_v47 }
  0xc4   : > { %v448_v48 = vpop.f32.mrf.mxu0 }
  0xc5   : > { %v449_v50 = vadd.f32 %v2537_v19, %v448_v48 }
  0xc7   : > { %v626_v51 = vmax.f32 %v449_v50, 0.0  ;;  %2073 = vmatmul.msk.f32.gmra.mxu0 %vm217_vm0, %v170_v49  ;;  %v186_v50 = vld [vmem:[%s2494_s17 + $0x138] sm:$0xff] }
  0xc8   : > { %2089 = vmatmul.msk.f32.gmra.mxu3 %vm217_vm0, %v186_v50  ;;  %v193_v50 = vld [vmem:[%s2494_s17 + $0x170] sm:$0xff] }
  0xc9   : > { %2121 = vmatmul.msk.f32.gmra.mxu1 %vm684_vm1, %v626_v51 }
  0xcc   : > { %v451_v52 = vpop.f32.mrf.mxu0 }
  0xcd   : > { %v452_v54 = vadd.f32 %v2537_v19, %v451_v52 }
  0xcf   : > { %v627_v55 = vmax.f32 %v452_v54, 0.0  ;;  %2074 = vmatmul.msk.f32.gmra.mxu0 %vm217_vm0, %v171_v53 }
  0xd1   : > { %2122 = vmatmul.msk.f32.gmra.mxu1 %vm684_vm1, %v627_v55 }
  0xd4   : > { %v454_v56 = vpop.f32.mrf.mxu0 }
  0xd5   : > { %v455_v58 = vadd.f32 %v2537_v19, %v454_v56 }
  0xd7   : > { %v628_v59 = vmax.f32 %v455_v58, 0.0  ;;  %2075 = vmatmul.msk.f32.gmra.mxu0 %vm217_vm0, %v172_v57  ;;  %v187_v58 = vld [vmem:[%s2494_s17 + $0x140] sm:$0xff] }
  0xd8   : > { %2090 = vmatmul.msk.f32.gmra.mxu3 %vm217_vm0, %v187_v58 }
  0xd9   : > { %2123 = vmatmul.msk.f32.gmra.mxu1 %vm684_vm1, %v628_v59 }
  0xdc   : > { %v457_v60 = vpop.f32.mrf.mxu0 }
  0xdd   : > { %v458_v62 = vadd.f32 %v2537_v19, %v457_v60 }
  0xdf   : > { %v629_v63 = vmax.f32 %v458_v62, 0.0  ;;  %2076 = vmatmul.msk.f32.gmra.mxu0 %vm217_vm0, %v173_v61 }
  0xe1   : > { %2124 = vmatmul.msk.f32.gmra.mxu1 %vm684_vm1, %v629_v63 }
  0xe4   : > { %v460_v0 = vpop.f32.mrf.mxu0 }
  0xe5   : > { %v461_v2 = vadd.f32 %v2537_v19, %v460_v0 }
  0xe7   : > { %v630_v3 = vmax.f32 %v461_v2, 0.0  ;;  %2077 = vmatmul.msk.f32.gmra.mxu0 %vm217_vm0, %v174_v1  ;;  %v188_v2 = vld [vmem:[%s2494_s17 + $0x148] sm:$0xff] }
  0xe8   : > { %2091 = vmatmul.msk.f32.gmra.mxu3 %vm217_vm0, %v188_v2 }
  0xe9   : > { %2125 = vmatmul.msk.f32.gmra.mxu1 %vm684_vm1, %v630_v3 }
  0xec   : > { %v463_v4 = vpop.f32.mrf.mxu0 }
  0xed   : > { %v464_v6 = vadd.f32 %v2537_v19, %v463_v4 }
  0xef   : > { %v631_v7 = vmax.f32 %v464_v6, 0.0  ;;  %2078 = vmatmul.msk.f32.gmra.mxu0 %vm217_vm0, %v175_v5 }
  0xf1   : > { %2126 = vmatmul.msk.f32.gmra.mxu1 %vm684_vm1, %v631_v7 }
  0xf4   : > { %v466_v9 = vpop.f32.mrf.mxu0 }
  0xf5   : > { %v467_v11 = vadd.f32 %v2537_v19, %v466_v9 }
  0xf7   : > { %v632_v12 = vmax.f32 %v467_v11, 0.0  ;;  %2079 = vmatmul.msk.f32.gmra.mxu0 %vm217_vm0, %v176_v10  ;;  %v189_v10 = vld [vmem:[%s2494_s17 + $0x150] sm:$0xff] }
  0xf8   : > { %2092 = vmatmul.msk.f32.gmra.mxu3 %vm217_vm0, %v189_v10 }
  0xf9   : > { %2127 = vmatmul.msk.f32.gmra.mxu1 %vm684_vm1, %v632_v12 }
  0xfc   : > { %v469_v14 = vpop.f32.mrf.mxu0 }
  0xfd   : > { %v470_v16 = vadd.f32 %v2537_v19, %v469_v14 }
  0xff   : > { %v633_v17 = vmax.f32 %v470_v16, 0.0  ;;  %2080 = vmatmul.msk.f32.gmra.mxu0 %vm217_vm0, %v177_v15 }
 0x100   : > { %2093 = vmatmul.msk.f32.gmra.mxu3 %vm217_vm0, %v190_v18  ;;  %v196_v18 = vld [vmem:[%s2494_s17 + $0x188] sm:$0xff] }
 0x101   : > { %2128 = vmatmul.msk.f32.gmra.mxu1 %vm684_vm1, %v633_v17 }
 0x104   : > { %v472_v20 = vpop.f32.mrf.mxu0 }
 0x105   : > { %v473_v22 = vadd.f32 %v2537_v19, %v472_v20 }
 0x107   : > { %v634_v23 = vmax.f32 %v473_v22, 0.0  ;;  %2081 = vmatmul.msk.f32.gmra.mxu0 %vm217_vm0, %v178_v21 }
 0x109   : > { %2129 = vmatmul.msk.f32.gmra.mxu1 %vm684_vm1, %v634_v23 }
 0x10c   : > { %v475_v27 = vpop.f32.mrf.mxu0 }
 0x10d   : > { %v476_v30 = vadd.f32 %v2537_v19, %v475_v27 }
 0x10e   : > { %v894_v31 = vpop.f32.mrf.mxu1 }
 0x10f   : > { %v635_v32 = vmax.f32 %v476_v30, 0.0  ;;  %v2621_v33 = vadd.f32 %v2614_v26, %v894_v31  ;;  %2082 = vmatmul.msk.f32.gmra.mxu0 %vm217_vm0, %v179_v28  ;;  %v191_v28 = vld [vmem:[%s2494_s17 + $0x160] sm:$0xff] }
 0x110   : > { %2094 = vmatmul.msk.f32.gmra.mxu3 %vm217_vm0, %v191_v28 }
 0x111   : > { %2130 = vmatmul.msk.f32.gmra.mxu1 %vm684_vm1, %v635_v32  ;;  %v1086_v35 = vmax.f32 %v2621_v33, 0.0 }
 0x113   : > { %v1153_v36 = vsel %vm1152_vm2, %v1086_v35, -inf }
 0x114   : > { %v478_v37 = vpop.f32.mrf.mxu0  ;;  %1217 = vmax.xlane.f32.xlu0 %v1153_v36 }
 0x115   : > { %v479_v38 = vadd.f32 %v2537_v19, %v478_v37 }
 0x116   : > { %v897_v39 = vpop.f32.mrf.mxu1 }
 0x117   : > { %v636_v40 = vmax.f32 %v479_v38, 0.0  ;;  %v2635_v41 = vadd.f32 %v2614_v26, %v897_v39  ;;  %v192_v39 = vld [vmem:[%s2494_s17 + $0x168] sm:$0xff] }
 0x118   : > { %2095 = vmatmul.msk.f32.gmra.mxu3 %vm217_vm0, %v192_v39 }
 0x119   : > { %v1087_v43 = vmax.f32 %v2635_v41, 0.0  ;;  %2131 = vmatmul.msk.f32.gmra.mxu1 %vm684_vm1, %v636_v40  ;;  %v201_v41 = vld [vmem:[%s2494_s17 + $0x1b0] sm:$0xff] }
 0x11b   : > { %v1154_v44 = vsel %vm1152_vm2, %v1087_v43, -inf }
 0x11c   : > { %v481_v45 = vpop.f32.mrf.mxu0  ;;  %1219 = vmax.xlane.f32.xlu0 %v1154_v44 }
 0x11d   : > { %v482_v46 = vadd.f32 %v2537_v19, %v481_v45 }
 0x11e   : > { %v900_v47 = vpop.f32.mrf.mxu1 }
 0x11f   : > { %v637_v48 = vmax.f32 %v482_v46, 0.0  ;;  %v2647_v49 = vadd.f32 %v2614_v26, %v900_v47 }
 0x120   : > { %2096 = vmatmul.msk.f32.gmra.mxu3 %vm217_vm0, %v193_v50  ;;  %v198_v50 = vld [vmem:[%s2494_s17 + $0x198] sm:$0xff] }
 0x121   : > { %2132 = vmatmul.msk.f32.gmra.mxu1 %vm684_vm1, %v637_v48  ;;  %v1088_v51 = vmax.f32 %v2647_v49, 0.0 }
 0x123   : > { %v1155_v52 = vsel %vm1152_vm2, %v1088_v51, -inf }
 0x124   : > { %v484_v53 = vpop.f32.mrf.mxu0  ;;  %1221 = vmax.xlane.f32.xlu1 %v1155_v52 }
 0x125   : > { %v485_v54 = vadd.f32 %v2537_v19, %v484_v53 }
 0x126   : > { %v903_v55 = vpop.f32.mrf.mxu1 }
 0x127   : > { %v638_v56 = vmax.f32 %v485_v54, 0.0  ;;  %v2659_v57 = vadd.f32 %v2614_v26, %v903_v55 }
 0x129   : > { %v1089_v59 = vmax.f32 %v2659_v57, 0.0  ;;  %2133 = vmatmul.msk.f32.gmra.mxu1 %vm684_vm1, %v638_v56 }
 0x12b   : > { %v1156_v60 = vsel %vm1152_vm2, %v1089_v59, -inf }
 0x12c   : > { %v487_v61 = vpop.f32.mrf.mxu0  ;;  %1223 = vmax.xlane.f32.xlu1 %v1156_v60 }
 0x12d   : > { %v488_v62 = vadd.f32 %v2537_v19, %v487_v61  ;;  %v194_v61 = vld [vmem:[%s2494_s17 + $0x178] sm:$0xff] }
 0x12e   : > { %v906_v63 = vpop.f32.mrf.mxu1  ;;  %2097 = vmatmul.msk.f32.gmra.mxu3 %vm217_vm0, %v194_v61 }
 0x12f   : > { %v639_v0 = vmax.f32 %v488_v62, 0.0  ;;  %v2671_v1 = vadd.f32 %v2614_v26, %v906_v63 }
 0x131   : > { %2134 = vmatmul.msk.f32.gmra.mxu1 %vm684_vm1, %v639_v0  ;;  %v1090_v3 = vmax.f32 %v2671_v1, 0.0 }
 0x133   : > { %v1157_v4 = vsel %vm1152_vm2, %v1090_v3, -inf }
 0x134   : > { %v490_v5 = vpop.f32.mrf.mxu0  ;;  %1225 = vmax.xlane.f32.xlu2 %v1157_v4 }
 0x135   : > { %v491_v6 = vadd.f32 %v2537_v19, %v490_v5 }
 0x136   : > { %v909_v7 = vpop.f32.mrf.mxu1 }
 0x137   : > { %v640_v8 = vmax.f32 %v491_v6, 0.0  ;;  %v2683_v9 = vadd.f32 %v2614_v26, %v909_v7  ;;  %v195_v7 = vld [vmem:[%s2494_s17 + $0x180] sm:$0xff] }
 0x138   : > { %2098 = vmatmul.msk.f32.gmra.mxu3 %vm217_vm0, %v195_v7 }
 0x139   : > { %v1091_v11 = vmax.f32 %v2683_v9, 0.0  ;;  %2135 = vmatmul.msk.f32.gmra.mxu1 %vm684_vm1, %v640_v8 }
 0x13b   : > { %v1158_v12 = vsel %vm1152_vm2, %v1091_v11, -inf }
 0x13c   : > { %v493_v13 = vpop.f32.mrf.mxu0  ;;  %1227 = vmax.xlane.f32.xlu2 %v1158_v12 }
 0x13d   : > { %v494_v14 = vadd.f32 %v2537_v19, %v493_v13 }
 0x13e   : > { %v912_v15 = vpop.f32.mrf.mxu1 }
 0x13f   : > { %v641_v16 = vmax.f32 %v494_v14, 0.0  ;;  %v2695_v17 = vadd.f32 %v2614_v26, %v912_v15 }
 0x140   : > { %2099 = vmatmul.msk.f32.gmra.mxu3 %vm217_vm0, %v196_v18 }
 0x141   : > { %v1092_v20 = vmax.f32 %v2695_v17, 0.0  ;;  %2136 = vmatmul.msk.f32.gmra.mxu1 %vm684_vm1, %v641_v16 }
 0x143   : > { %v1159_v21 = vsel %vm1152_vm2, %v1092_v20, -inf }
 0x144   : > { %v496_v22 = vpop.f32.mrf.mxu0  ;;  %1229 = vmax.xlane.f32.xlu0 %v1159_v21 }
 0x145   : > { %v497_v23 = vadd.f32 %v2537_v19, %v496_v22 }
 0x146   : > { %v915_v24 = vpop.f32.mrf.mxu1 }
 0x147   : > { %v642_v25 = vmax.f32 %v497_v23, 0.0  ;;  %v2707_v27 = vadd.f32 %v2614_v26, %v915_v24  ;;  %v526_v24 = vpop.f32.mrf.mxu3 }
 0x149   : > { %v1093_v30 = vmax.f32 %v2707_v27, 0.0  ;;  %2137 = vmatmul.msk.f32.gmra.mxu1 %vm684_vm1, %v642_v25 }
 0x14b   : > { %v1160_v31 = vsel %vm1152_vm2, %v1093_v30, -inf }
 0x14c   : > { %v499_v32 = vpop.f32.mrf.mxu0  ;;  %1231 = vmax.xlane.f32.xlu1 %v1160_v31 }
 0x14d   : > { %v500_v34 = vadd.f32 %v2537_v19, %v499_v32 }
 0x14e   : > { %v918_v36 = vpop.f32.mrf.mxu1 }
 0x14f   : > { %v643_v37 = vmax.f32 %v500_v34, 0.0  ;;  %v2719_v38 = vadd.f32 %v2614_v26, %v918_v36  ;;  %v197_v34 = vld [vmem:[%s2494_s17 + $0x190] sm:$0xff] }
 0x150   : > { %2100 = vmatmul.msk.f32.gmra.mxu3 %vm217_vm0, %v197_v34 }
 0x151   : > { %v1094_v40 = vmax.f32 %v2719_v38, 0.0  ;;  %2138 = vmatmul.msk.f32.gmra.mxu1 %vm684_vm1, %v643_v37 }
 0x153   : > { %v1161_v42 = vsel %vm1152_vm2, %v1094_v40, -inf }
 0x154   : > { %v502_v44 = vpop.f32.mrf.mxu0  ;;  %1233 = vmax.xlane.f32.xlu2 %v1161_v42  ;;  %v529_v42 = vpop.f32.mrf.mxu3 }
 0x155   : > { %v503_v45 = vadd.f32 %v2537_v19, %v502_v44 }
 0x156   : > { %v921_v46 = vpop.f32.mrf.mxu1 }
 0x157   : > { %v644_v47 = vmax.f32 %v503_v45, 0.0  ;;  %v2731_v48 = vadd.f32 %v2614_v26, %v921_v46 }
 0x158   : > { %2101 = vmatmul.msk.f32.gmra.mxu3 %vm217_vm0, %v198_v50 }
 0x159   : > { %v1095_v52 = vmax.f32 %v2731_v48, 0.0  ;;  %2139 = vmatmul.msk.f32.gmra.mxu1 %vm684_vm1, %v644_v47 }
 0x15b   : > { %v1162_v53 = vsel %vm1152_vm2, %v1095_v52, -inf }
 0x15c   : > { %v505_v54 = vpop.f32.mrf.mxu0  ;;  %1235 = vmax.xlane.f32.xlu0 %v1162_v53 }
 0x15d   : > { %v506_v55 = vadd.f32 %v2537_v19, %v505_v54 }
 0x15e   : > { %v924_v56 = vpop.f32.mrf.mxu1 }
 0x15f   : > { %v645_v58 = vmax.f32 %v506_v55, 0.0  ;;  %v2743_v60 = vadd.f32 %v2614_v26, %v924_v56  ;;  %v532_v56 = vpop.f32.mrf.mxu3 }
 0x161   : > { %v1096_v62 = vmax.f32 %v2743_v60, 0.0  ;;  %2140 = vmatmul.msk.f32.gmra.mxu1 %vm684_vm1, %v645_v58 }
 0x163   : > { %v1163_v63 = vsel %vm1152_vm2, %v1096_v62, -inf }
 0x164   : > { %v508_v0 = vpop.f32.mrf.mxu0  ;;  %1237 = vmax.xlane.f32.xlu1 %v1163_v63 }
 0x165   : > { %v509_v2 = vadd.f32 %v2537_v19, %v508_v0 }
 0x166   : > { %v927_v4 = vpop.f32.mrf.mxu1 }
 0x167   : > { %v646_v5 = vmax.f32 %v509_v2, 0.0  ;;  %v2755_v6 = vadd.f32 %v2614_v26, %v927_v4  ;;  %v199_v4 = vld [vmem:[%s2494_s17 + $0x1a0] sm:$0xff] }
 0x168   : > { %2102 = vmatmul.msk.f32.gmra.mxu3 %vm217_vm0, %v199_v4 }
 0x169   : > { %v1097_v8 = vmax.f32 %v2755_v6, 0.0  ;;  %2141 = vmatmul.msk.f32.gmra.mxu1 %vm684_vm1, %v646_v5 }
 0x16b   : > { %v1164_v10 = vsel %vm1152_vm2, %v1097_v8, -inf }
 0x16c   : > { %v511_v12 = vpop.f32.mrf.mxu0  ;;  %1239 = vmax.xlane.f32.xlu2 %v1164_v10 }
 0x16d   : > { %v512_v13 = vadd.f32 %v2537_v19, %v511_v12 }
 0x16e   : > { %v930_v14 = vpop.f32.mrf.mxu1 }
 0x16f   : > { %v647_v15 = vmax.f32 %v512_v13, 0.0  ;;  %v2767_v16 = vadd.f32 %v2614_v26, %v930_v14  ;;  %v535_v13 = vpop.f32.mrf.mxu3 }
 0x171   : > { %v1098_v21 = vmax.f32 %v2767_v16, 0.0  ;;  %2142 = vmatmul.msk.f32.gmra.mxu1 %vm684_vm1, %v647_v15 }
 0x173   : > { %v1165_v22 = vsel %vm1152_vm2, %v1098_v21, -inf }
 0x174   : > { %v514_v23 = vpop.f32.mrf.mxu0  ;;  %1241 = vmax.xlane.f32.xlu0 %v1165_v22 }
 0x175   : > { %v515_v25 = vadd.f32 %v2537_v19, %v514_v23 }
 0x176   : > { %v933_v28 = vpop.f32.mrf.mxu1 }
 0x177   : > { %v648_v31 = vmax.f32 %v515_v25, 0.0  ;;  %v2779_v32 = vadd.f32 %v2614_v26, %v933_v28  ;;  %v527_v28 = vadd.f32 %v2537_v19, %v526_v24 }
 0x179   : > { %v1099_v36 = vmax.f32 %v2779_v32, 0.0  ;;  %2143 = vmatmul.msk.f32.gmra.mxu1 %vm684_vm1, %v648_v31 }
 0x17b   : > { %v1166_v37 = vsel %vm1152_vm2, %v1099_v36, -inf }
 0x17c   : > { %v517_v39 = vpop.f32.mrf.mxu0  ;;  %1243 = vmax.xlane.f32.xlu1 %v1166_v37  ;;  %v2835_v37 = vpop.f32.mrf.mxu3 }
 0x17d   : > { %v518_v44 = vadd.f32 %v2537_v19, %v517_v39  ;;  %v652_v39 = vmax.f32 %v527_v28, 0.0 }
 0x17e   : > { %v936_v45 = vpop.f32.mrf.mxu1 }
 0x17f   : > { %v649_v46 = vmax.f32 %v518_v44, 0.0  ;;  %v2791_v47 = vadd.f32 %v2614_v26, %v936_v45 }
 0x181   : > { %v1100_v53 = vmax.f32 %v2791_v47, 0.0  ;;  %2144 = vmatmul.msk.f32.gmra.mxu1 %vm684_vm1, %v649_v46 }
 0x183   : > { %v1167_v54 = vsel %vm1152_vm2, %v1100_v53, -inf }
 0x184   : > { %v520_v55 = vpop.f32.mrf.mxu0  ;;  %1245 = vmax.xlane.f32.xlu2 %v1167_v54  ;;  %v530_v54 = vadd.f32 %v2537_v19, %v529_v42 }
 0x185   : > { %v521_v58 = vadd.f32 %v2537_v19, %v520_v55 }
 0x186   : > { %v939_v61 = vpop.f32.mrf.mxu1  ;;  %v653_v42 = vmax.f32 %v530_v54, 0.0 }
 0x187   : > { %v650_v63 = vmax.f32 %v521_v58, 0.0  ;;  %v2803_v0 = vadd.f32 %v2614_v26, %v939_v61  ;;  %v1218_v2 = vpop.xlane.xlu0 %1217 }
 0x188   : > { %v2811_v7 = vsub.f32 %v1086_v35, %v1218_v2  ;;  %v200_v35 = vld [vmem:[%s2494_s17 + $0x1a8] sm:$0xff] }
 0x189   : > { %v1101_v5 = vmax.f32 %v2803_v0, 0.0  ;;  %2145 = vmatmul.msk.f32.gmra.mxu1 %vm684_vm1, %v650_v63  ;;  %2103 = vmatmul.msk.f32.gmra.mxu3 %vm217_vm0, %v200_v35  ;;  %v2856_v63 = vpop.f32.mrf.mxu3 }
 0x18a   : > { %v1409_v15 = vmul.f32 1.442695, %v2811_v7 }
 0x18b   : > { %v1168_v10 = vsel %vm1152_vm2, %v1101_v5, -inf }
 0x18c   : > { %v523_v12 = vpop.f32.mrf.mxu0  ;;  %1247 = vmax.xlane.f32.xlu0 %v1168_v10  ;;  %2193 = vpow2.f32 %v1409_v15  ;;  %v533_v15 = vadd.f32 %v2537_v19, %v532_v56 }
 0x18d   : > { %v524_v14 = vadd.f32 %v2537_v19, %v523_v12  ;;  %v202_v12 = vld [vmem:[%s2494_s17 + $0x1b8] sm:$0xff] }
 0x18e   : > { %v942_v18 = vpop.f32.mrf.mxu1  ;;  %v654_v56 = vmax.f32 %v533_v15, 0.0 }
 0x18f   : > { %v651_v22 = vmax.f32 %v524_v14, 0.0  ;;  %v2820_v23 = vadd.f32 %v2614_v26, %v942_v18  ;;  %v1220_v33 = vpop.xlane.xlu0 %1219 }
 0x190   : > { %v2829_v31 = vsub.f32 %v1087_v43, %v1220_v33 }
 0x191   : > { %v1102_v25 = vmax.f32 %v2820_v23, 0.0  ;;  %2146 = vmatmul.msk.f32.vlgmr.msra.gmra.mxu2 %vm684_vm1, %v651_v22  ;;  %2104 = vmatmul.msk.f32.gmra.mxu3 %vm217_vm0, %v201_v41  ;;  %v2877_v35 = vpop.f32.mrf.mxu3 }
 0x192   : > { %v1411_v44 = vmul.f32 1.442695, %v2829_v31  ;;  %v2194_v50 = vpop.eup %2193 }
 0x193   : > { %v1169_v34 = vsel %vm1152_vm2, %v1102_v25, -inf  ;;  %v1537_v61 = vsel %vm1152_vm2, %v2194_v50, 0.0 }
 0x194   : > { %1249 = vmax.xlane.f32.xlu1 %v1169_v34  ;;  %2195 = vpow2.f32 %v1411_v44  ;;  %v203_v44 = vld [vmem:[%s2494_s17 + $0x1c0] sm:$0xff] }
 0x196   : > { %v945_v45 = vpop.f32.mrf.mxu1 }
 0x197   : > { %v2839_v24 = vadd.f32 %v2614_v26, %v945_v45  ;;  %v1222_v46 = vpop.xlane.xlu1 %1221 }
 0x198   : > { %v2848_v55 = vsub.f32 %v1088_v51, %v1222_v46  ;;  %v536_v46 = vadd.f32 %v2537_v19, %v535_v13 }
 0x199   : > { %v1103_v43 = vmax.f32 %v2839_v24, 0.0  ;;  %2147 = vmatmul.msk.f32.gmra.mxu2 %vm684_vm1, %v652_v39  ;;  %2105 = vmatmul.msk.f32.gmra.mxu3 %vm217_vm0, %v202_v12 }
 0x19a   : > { %v1413_v2 = vmul.f32 1.442695, %v2848_v55  ;;  %v2196_v10 = vpop.eup %2195  ;;  %v655_v13 = vmax.f32 %v536_v46, 0.0 }
 0x19b   : > { %v1170_v58 = vsel %vm1152_vm2, %v1103_v43, -inf  ;;  %v1538_v33 = vsel %vm1152_vm2, %v2196_v10, 0.0  ;;  %v539_v10 = vadd.f32 %v2537_v19, %v2835_v37 }
 0x19c   : > { %1251 = vmax.xlane.f32.xlu2 %v1170_v58  ;;  %1601 = vadd.xlane.f32.xlu1 %v1537_v61  ;;  %2197 = vpow2.f32 %v1413_v2  ;;  %v2898_v58 = vpop.f32.mrf.mxu3 }
 0x19d   : > { %v656_v37 = vmax.f32 %v539_v10, 0.0  ;;  %v545_v10 = vadd.f32 %v2537_v19, %v2877_v35 }
 0x19e   : > { %v948_v4 = vpop.f32.mrf.mxu1 }
 0x19f   : > { %v2860_v49 = vadd.f32 %v2614_v26, %v948_v4  ;;  %v1224_v51 = vpop.xlane.xlu1 %1223  ;;  %v204_v4 = vld [vmem:[%s2494_s17 + $0x1c8] sm:$0xff]  ;;  %v658_v35 = vmax.f32 %v545_v10, 0.0 }
 0x1a0   : > { %v2869_v18 = vsub.f32 %v1089_v59, %v1224_v51  ;;  %v208_v10 = vld [vmem:[%s2494_s17 + $0x1e8] sm:$0xff] }
 0x1a1   : > { %v1104_v14 = vmax.f32 %v2860_v49, 0.0  ;;  %2148 = vmatmul.msk.f32.gmra.mxu2 %vm684_vm1, %v653_v42  ;;  %2106 = vmatmul.msk.f32.gmra.mxu3 %vm217_vm0, %v203_v44  ;;  %v542_v44 = vadd.f32 %v2537_v19, %v2856_v63 }
 0x1a2   : > { %v1415_v28 = vmul.f32 1.442695, %v2869_v18  ;;  %v2198_v39 = vpop.eup %2197 }
 0x1a3   : > { %v1171_v22 = vsel %vm1152_vm2, %v1104_v14, -inf  ;;  %v1539_v41 = vsel %vm1152_vm2, %v2198_v39, 0.0  ;;  %v657_v63 = vmax.f32 %v542_v44, 0.0 }
 0x1a4   : > { %1253 = vmax.xlane.f32.xlu0 %v1171_v22  ;;  %1603 = vadd.xlane.f32.xlu2 %v1538_v33  ;;  %2199 = vpow2.f32 %v1415_v28  ;;  %v2920_v33 = vpop.f32.mrf.mxu3 }
 0x1a6   : > { %v951_v34 = vpop.f32.mrf.mxu1 }
 0x1a7   : > { %v2881_v57 = vadd.f32 %v2614_v26, %v951_v34  ;;  %v1226_v59 = vpop.xlane.xlu2 %1225 }
 0x1a8   : > { %v2890_v50 = vsub.f32 %v1090_v3, %v1226_v59  ;;  %v205_v59 = vld [vmem:[%s2494_s17 + $0x1d0] sm:$0xff] }
 0x1a9   : > { %v1105_v45 = vmax.f32 %v2881_v57, 0.0  ;;  %2149 = vmatmul.msk.f32.gmra.mxu2 %vm684_vm1, %v654_v56  ;;  %2107 = vmatmul.msk.f32.gmra.mxu3 %vm217_vm0, %v204_v4 }
 0x1aa   : > { %v1417_v61 = vmul.f32 1.442695, %v2890_v50  ;;  %v2200_v2 = vpop.eup %2199 }
 0x1ab   : > { %v1172_v54 = vsel %vm1152_vm2, %v1105_v45, -inf  ;;  %v1540_v15 = vsel %vm1152_vm2, %v2200_v2, 0.0  ;;  %v206_v2 = vld [vmem:[%s2494_s17 + $0x1d8] sm:$0xff] }
 0x1ac   : > { %1605 = vadd.xlane.f32.xlu0 %v1539_v41  ;;  %1255 = vmax.xlane.f32.xlu1 %v1172_v54  ;;  %2201 = vpow2.f32 %v1417_v61 }
 0x1ae   : > { %v954_v42 = vpop.f32.mrf.mxu1 }
 0x1af   : > { %v2902_v1 = vadd.f32 %v2614_v26, %v954_v42  ;;  %v1228_v3 = vpop.xlane.xlu2 %1227 }
 0x1b0   : > { %v2912_v12 = vsub.f32 %v1091_v11, %v1228_v3 }
 0x1b1   : > { %v1106_v51 = vmax.f32 %v2902_v1, 0.0  ;;  %2150 = vmatmul.msk.f32.gmra.mxu2 %vm684_vm1, %v655_v13  ;;  %2108 = vmatmul.msk.f32.gmra.mxu3 %vm217_vm0, %v205_v59  ;;  %v2942_v13 = vpop.f32.mrf.mxu3  ;;  %v207_v59 = vld [vmem:[%s2494_s17 + $0x1e0] sm:$0xff] }
 0x1b2   : > { %v1419_v56 = vmul.f32 1.442695, %v2912_v12  ;;  %v2202_v34 = vpop.eup %2201 }
 0x1b3   : > { %v1173_v22 = vsel %vm1152_vm2, %v1106_v51, -inf  ;;  %v1541_v54 = vsel %vm1152_vm2, %v2202_v34, 0.0 }
 0x1b4   : > { %1607 = vadd.xlane.f32.xlu1 %v1540_v15  ;;  %1257 = vmax.xlane.f32.xlu2 %v1173_v22  ;;  %2203 = vpow2.f32 %v1419_v56 }
 0x1b6   : > { %v957_v28 = vpop.f32.mrf.mxu1 }
 0x1b7   : > { %v2924_v9 = vadd.f32 %v2614_v26, %v957_v28  ;;  %v1230_v11 = vpop.xlane.xlu0 %1229 }
 0x1b8   : > { %v2934_v46 = vsub.f32 %v1092_v20, %v1230_v11 }
 0x1b9   : > { %v1107_v39 = vmax.f32 %v2924_v9, 0.0  ;;  %2151 = vmatmul.msk.f32.gmra.mxu2 %vm684_vm1, %v656_v37  ;;  %2109 = vmatmul.msk.f32.gmra.mxu3 %vm217_vm0, %v206_v2  ;;  %v2964_v56 = vpop.f32.mrf.mxu3 }
 0x1ba   : > { %v1421_v61 = vmul.f32 1.442695, %v2934_v46  ;;  %v2204_v3 = vpop.eup %2203 }
 0x1bb   : > { %v1174_v41 = vsel %vm1152_vm2, %v1107_v39, -inf  ;;  %v1542_v22 = vsel %vm1152_vm2, %v2204_v3, 0.0 }
 0x1bc   : > { %1259 = vmax.xlane.f32.xlu0 %v1174_v41  ;;  %1609 = vadd.xlane.f32.xlu2 %v1541_v54  ;;  %2205 = vpow2.f32 %v1421_v61  ;;  %v548_v41 = vadd.f32 %v2537_v19, %v2898_v58 }
 0x1be   : > { %v960_v42 = vpop.f32.mrf.mxu1  ;;  %v659_v58 = vmax.f32 %v548_v41, 0.0 }
 0x1bf   : > { %v2946_v17 = vadd.f32 %v2614_v26, %v960_v42  ;;  %v1232_v20 = vpop.xlane.xlu1 %1231 }
 0x1c0   : > { %v2956_v15 = vsub.f32 %v1093_v30, %v1232_v20 }
 0x1c1   : > { %v1108_v4 = vmax.f32 %v2946_v17, 0.0  ;;  %2152 = vmatmul.msk.f32.gmra.mxu2 %vm684_vm1, %v657_v63  ;;  %2110 = vmatmul.msk.f32.gmra.mxu3 %vm217_vm0, %v207_v59  ;;  %v2986_v42 = vpop.f32.mrf.mxu3 }
 0x1c2   : > { %v1423_v28 = vmul.f32 1.442695, %v2956_v15  ;;  %v2206_v34 = vpop.eup %2205 }
 0x1c3   : > { %v1175_v37 = vsel %vm1152_vm2, %v1108_v4, -inf  ;;  %v1543_v61 = vsel %vm1152_vm2, %v2206_v34, 0.0 }
 0x1c4   : > { %1611 = vadd.xlane.f32.xlu0 %v1542_v22  ;;  %1261 = vmax.xlane.f32.xlu1 %v1175_v37  ;;  %2207 = vpow2.f32 %v1423_v28  ;;  %v551_v37 = vadd.f32 %v2537_v19, %v2920_v33 }
 0x1c6   : > { %v963_v11 = vpop.f32.mrf.mxu1  ;;  %v660_v34 = vmax.f32 %v551_v37, 0.0 }
 0x1c7   : > { %v2968_v27 = vadd.f32 %v2614_v26, %v963_v11  ;;  %v1234_v30 = vpop.xlane.xlu2 %1233 }
 0x1c8   : > { %v2978_v54 = vsub.f32 %v1094_v40, %v1234_v30 }
 0x1c9   : > { %v1109_v44 = vmax.f32 %v2968_v27, 0.0  ;;  %2153 = vmatmul.msk.f32.gmra.mxu2 %vm684_vm1, %v658_v35  ;;  %2111 = vmatmul.msk.f32.gmra.mxu3 %vm217_vm0, %v208_v10  ;;  %v562_v30 = vpop.f32.mrf.mxu3 }
 0x1ca   : > { %v1425_v20 = vmul.f32 1.442695, %v2978_v54  ;;  %v2208_v2 = vpop.eup %2207 }
 0x1cb   : > { %v1176_v63 = vsel %vm1152_vm2, %v1109_v44, -inf  ;;  %v1544_v11 = vsel %vm1152_vm2, %v2208_v2, 0.0 }
 0x1cc   : > { %1263 = vmax.xlane.f32.xlu2 %v1176_v63  ;;  %1613 = vadd.xlane.f32.xlu1 %v1543_v61  ;;  %2209 = vpow2.f32 %v1425_v20  ;;  %v209_v63 = vld [vmem:[%s2494_s17 + $0x1f0] sm:$0xff] }
 0x1ce   : > { %v966_v3 = vpop.f32.mrf.mxu1 }
 0x1cf   : > { %v2990_v38 = vadd.f32 %v2614_v26, %v966_v3  ;;  %v1236_v40 = vpop.xlane.xlu0 %1235 }
 0x1d0   : > { %v3000_v35 = vsub.f32 %v1095_v52, %v1236_v40 }
 0x1d1   : > { %v1110_v22 = vmax.f32 %v2990_v38, 0.0  ;;  %2154 = vmatmul.msk.f32.gmra.mxu2 %vm684_vm1, %v659_v58  ;;  %v554_v58 = vadd.f32 %v2537_v19, %v2942_v13  ;;  %2112 = vmatmul.msk.f32.gmra.mxu3 %vm217_vm0, %v209_v63  ;;  %v565_v2 = vpop.f32.mrf.mxu3 }
 0x1d2   : > { %v1427_v33 = vmul.f32 1.442695, %v3000_v35  ;;  %v2210_v52 = vpop.eup %2209 }
 0x1d3   : > { %v1177_v28 = vsel %vm1152_vm2, %v1110_v22, -inf  ;;  %v1545_v3 = vsel %vm1152_vm2, %v2210_v52, 0.0  ;;  %v661_v10 = vmax.f32 %v554_v58, 0.0 }
 0x1d4   : > { %1265 = vmax.xlane.f32.xlu0 %v1177_v28  ;;  %1615 = vadd.xlane.f32.xlu2 %v1544_v11  ;;  %2211 = vpow2.f32 %v1427_v33  ;;  %v210_v11 = vld [vmem:[%s2494_s17 + $0x1f8] sm:$0xff]  ;;  %v557_v33 = vadd.f32 %v2537_v19, %v2964_v56 }
 0x1d6   : > { %v969_v59 = vpop.f32.mrf.mxu1  ;;  %v662_v58 = vmax.f32 %v557_v33, 0.0 }
 0x1d7   : > { %v3010_v41 = vadd.f32 %v2614_v26, %v969_v59  ;;  %v1238_v48 = vpop.xlane.xlu1 %1237 }
 0x1d8   : > { %v3020_v20 = vsub.f32 %v1096_v62, %v1238_v48 }
 0x1d9   : > { %v1111_v61 = vmax.f32 %v3010_v41, 0.0  ;;  %2155 = vmatmul.msk.f32.gmra.mxu2 %vm684_vm1, %v660_v34  ;;  %2113 = vmatmul.msk.f32.gmra.mxu3 %vm217_vm0, %v210_v11  ;;  %v568_v63 = vpop.f32.mrf.mxu3 }
 0x1da   : > { %v1429_v13 = vmul.f32 1.442695, %v3020_v20  ;;  %v2212_v62 = vpop.eup %2211 }
 0x1db   : > { %v1178_v40 = vsel %vm1152_vm2, %v1111_v61, -inf  ;;  %v1546_v52 = vsel %vm1152_vm2, %v2212_v62, 0.0 }
 0x1dc   : > { %1617 = vadd.xlane.f32.xlu0 %v1545_v3  ;;  %1267 = vmax.xlane.f32.xlu1 %v1178_v40  ;;  %2213 = vpow2.f32 %v1429_v13  ;;  %v560_v13 = vadd.f32 %v2537_v19, %v2986_v42 }
 0x1de   : > { %v972_v37 = vpop.f32.mrf.mxu1  ;;  %v663_v33 = vmax.f32 %v560_v13, 0.0 }
 0x1df   : > { %v3030_v28 = vadd.f32 %v2614_v26, %v972_v37  ;;  %v1240_v60 = vpop.xlane.xlu2 %1239 }
 0x1e0   : > { %v3040_v59 = vsub.f32 %v1097_v8, %v1240_v60 }
 0x1e1   : > { %v1112_v34 = vmax.f32 %v3030_v28, 0.0  ;;  %2156 = vmatmul.msk.f32.gmra.mxu2 %vm684_vm1, %v661_v10  ;;  %v571_v11 = vpop.f32.mrf.mxu3 }
 0x1e2   : > { %v1431_v56 = vmul.f32 1.442695, %v3040_v59  ;;  %v2214_v8 = vpop.eup %2213 }
 0x1e3   : > { %v1179_v48 = vsel %vm1152_vm2, %v1112_v34, -inf  ;;  %v1547_v62 = vsel %vm1152_vm2, %v2214_v8, 0.0 }
 0x1e4   : > { %1269 = vmax.xlane.f32.xlu2 %v1179_v48  ;;  %1619 = vadd.xlane.f32.xlu1 %v1546_v52  ;;  %2215 = vpow2.f32 %v1431_v56 }
 0x1e6   : > { %v975_v3 = vpop.f32.mrf.mxu1 }
 0x1e7   : > { %v3050_v40 = vadd.f32 %v2614_v26, %v975_v3  ;;  %v1242_v6 = vpop.xlane.xlu0 %1241 }
 0x1e8   : > { %v3058_v37 = vsub.f32 %v1098_v21, %v1242_v6 }
 0x1e9   : > { %v1113_v10 = vmax.f32 %v3050_v40, 0.0  ;;  %2157 = vmatmul.msk.f32.gmra.mxu2 %vm684_vm1, %v662_v58  ;;  %v3075_v58 = vld [vmem:[%s3980_s1 + $0x18] ss:$0 sm:$0xff]  ;;  %v574_v13 = vpop.f32.mrf.mxu3 }
 0x1ea   : > { %v1433_v48 = vmul.f32 1.442695, %v3058_v37  ;;  %v2216_v21 = vpop.eup %2215  ;;  %v563_v56 = vadd.f32 %v3075_v58, %v562_v30 }
 0x1eb   : > { %v1180_v60 = vsel %vm1152_vm2, %v1113_v10, -inf  ;;  %v1548_v6 = vsel %vm1152_vm2, %v2216_v21, 0.0 }
 0x1ec   : > { %1271 = vmax.xlane.f32.xlu0 %v1180_v60  ;;  %1621 = vadd.xlane.f32.xlu2 %v1547_v62  ;;  %2217 = vpow2.f32 %v1433_v48  ;;  %v664_v60 = vmax.f32 %v563_v56, 0.0 }
 0x1ee   : > { %v978_v19 = vpop.f32.mrf.mxu1 }
 0x1ef   : > { %v3068_v42 = vadd.f32 %v2614_v26, %v978_v19  ;;  %v1244_v16 = vpop.xlane.xlu1 %1243  ;;  %v566_v19 = vadd.f32 %v3075_v58, %v565_v2 }
 0x1f0   : > { %v3080_v3 = vsub.f32 %v1099_v36, %v1244_v16 }
 0x1f1   : > { %v1114_v52 = vmax.f32 %v3068_v42, 0.0  ;;  %2158 = vmatmul.msk.f32.gmra.mxu2 %vm684_vm1, %v663_v33 }
 0x1f2   : > { %v1435_v62 = vmul.f32 1.442695, %v3080_v3  ;;  %v2218_v36 = vpop.eup %2217 }
 0x1f3   : > { %v1181_v8 = vsel %vm1152_vm2, %v1114_v52, -inf  ;;  %v1549_v56 = vsel %vm1152_vm2, %v2218_v36, 0.0 }
 0x1f4   : > { %1623 = vadd.xlane.f32.xlu0 %v1548_v6  ;;  %1273 = vmax.xlane.f32.xlu1 %v1181_v8  ;;  %2219 = vpow2.f32 %v1435_v62  ;;  %v3105_v6 = vpop.f32.mrf.mxu3  ;;  %v665_v8 = vmax.f32 %v566_v19, 0.0 }
 0x1f6   : > { %v981_v30 = vpop.f32.mrf.mxu1 }
 0x1f7   : > { %v3090_v33 = vadd.f32 %v2614_v26, %v981_v30  ;;  %v1246_v32 = vpop.xlane.xlu2 %1245 }
 0x1f8   : > { %v3097_v16 = vsub.f32 %v1100_v53, %v1246_v32  ;;  %v569_v32 = vadd.f32 %v3075_v58, %v568_v63 }
 0x1f9   : > { %v1115_v48 = vmax.f32 %v3090_v33, 0.0  ;;  %2159 = vmatmul.msk.f32.gmra.mxu2 %vm684_vm1, %v664_v60 }
 0x1fa   : > { %v1437_v2 = vmul.f32 1.442695, %v3097_v16  ;;  %v2220_v62 = vpop.eup %2219 }
 0x1fb   : > { %v1182_v21 = vsel %vm1152_vm2, %v1115_v48, -inf }
 0x1fc   : > { %1275 = vmax.xlane.f32.xlu2 %v1182_v21  ;;  %1625 = vadd.xlane.f32.xlu1 %v1549_v56  ;;  %2221 = vpow2.f32 %v1437_v2  ;;  %v1550_v21 = vsel %vm1152_vm2, %v2220_v62, 0.0  ;;  %v666_v56 = vmax.f32 %v569_v32, 0.0  ;;  %v3125_v63 = vpop.f32.mrf.mxu3  ;;  %v572_v62 = vadd.f32 %v3075_v58, %v571_v11 }
 0x1fe   : > { %v984_v60 = vpop.f32.mrf.mxu1  ;;  %v667_v23 = vmax.f32 %v572_v62, 0.0 }
 0x1ff   : > { %v3109_v47 = vadd.f32 %v2614_v26, %v984_v60  ;;  %v1248_v53 = vpop.xlane.xlu0 %1247 }
 0x200   : > { %v3116_v36 = vsub.f32 %v1101_v5, %v1248_v53 }
 0x201   : > { %v3982_v30 = vmax.f32 %v3109_v47, 0.0  ;;  %2160 = vmatmul.msk.f32.gmra.mxu2 %vm684_vm1, %v665_v8 }
 0x202   : > { %v1439_v8 = vmul.f32 1.442695, %v3116_v36  ;;  %v2222_v2 = vpop.eup %2221 }
 0x203   : > { %v1183_v19 = vsel %vm1152_vm2, %v3982_v30, -inf }
 0x204   : > { %1277 = vmax.xlane.f32.xlu0 %v1183_v19  ;;  %1627 = vadd.xlane.f32.xlu2 %v1550_v21  ;;  %2223 = vpow2.f32 %v1439_v8  ;;  %v1551_v19 = vsel %vm1152_vm2, %v2222_v2, 0.0  ;;  %v3148_v8 = vpop.f32.mrf.mxu3 }
 0x206   : > { %v987_v60 = vpop.f32.mrf.mxu1 }
 0x207   : > { %v3128_v0 = vadd.f32 %v2614_v26, %v987_v60  ;;  %v1250_v5 = vpop.xlane.xlu1 %1249 }
 0x208   : > { %v3132_v53 = vsub.f32 %v1102_v25, %v1250_v5  ;;  %v575_v5 = vadd.f32 %v3075_v58, %v574_v13 }
 0x209   : > { %v3983_v30 = vmax.f32 %v3128_v0, 0.0  ;;  %2161 = vmatmul.msk.f32.gmra.mxu2 %vm684_vm1, %v666_v56 }
 0x20a   : > { %v1441_v32 = vmul.f32 1.442695, %v3132_v53  ;;  %v2224_v56 = vpop.eup %2223 }
 0x20b   : > { %v1184_v21 = vsel %vm1152_vm2, %v3983_v30, -inf }
 0x20c   : > { %2225 = vpow2.f32 %v1441_v32  ;;  %1629 = vadd.xlane.f32.xlu0 %v1551_v19  ;;  %1279 = vmax.xlane.f32.xlu1 %v1184_v21  ;;  %v1552_v19 = vsel %vm1152_vm2, %v2224_v56, 0.0 }
 0x20f   : > { %v1252_v25 = vpop.xlane.xlu2 %1251  ;;  %v1602_v60 = vpop.xlane.xlu1 %1601 }
 0x210   : > { %v3146_v11 = vsub.f32 %v1103_v43, %v1252_v25  ;;  %2227 = vlog2.f32 %v1602_v60  ;;  %v668_v43 = vmax.f32 %v575_v5, 0.0 }
 0x211   : > { %2162 = vmatmul.msk.f32.gmra.mxu2 %vm684_vm1, %v667_v23 }
 0x212   : > { %v2226_v2 = vpop.eup %2225  ;;  %v1443_v32 = vmul.f32 1.442695, %v3146_v11 }
 0x213   : > { %v1553_v62 = vsel %vm1152_vm2, %v2226_v2, 0.0  ;;  %v578_v2 = vadd.f32 %v3075_v58, %v3105_v6 }
 0x214   : > { %2229 = vpow2.f32 %v1443_v32  ;;  %v990_v24 = vpop.f32.mrf.mxu2  ;;  %1633 = vadd.xlane.f32.xlu2 %v1553_v62  ;;  %1631 = vadd.xlane.f32.xlu1 %v1552_v19  ;;  %v3177_v19 = vpop.f32.mrf.mxu3 }
 0x215   : > { %v3158_v21 = vadd.f32 %v2614_v26, %v990_v24 }
 0x216   : > { %v2228_v23 = vpop.eup %2227 }
 0x217   : > { %v1730_v13 = vmul.f32 0.6931472, %v2228_v23  ;;  %v1118_v25 = vmax.f32 %v3158_v21, 0.0  ;;  %v1604_v60 = vpop.xlane.xlu2 %1603  ;;  %v1254_v30 = vpop.xlane.xlu0 %1253 }
 0x218   : > { %2231 = vlog2.f32 %v1604_v60  ;;  %v3170_v56 = vsub.f32 %v1104_v14, %v1254_v30  ;;  %v669_v14 = vmax.f32 %v578_v2, 0.0  ;;  %v581_v2 = vadd.f32 %v3075_v58, %v3125_v63 }
 0x219   : > { %v1857_v5 = vsub.f32 %v2811_v7, %v1730_v13  ;;  %2163 = vmatmul.msk.f32.gmra.mxu2 %vm684_vm1, %v668_v43  ;;  %v1185_v7 = vsel %vm1152_vm2, %v1118_v25, -inf }
 0x21a   : > { %v2230_v32 = vpop.eup %2229  ;;  %v1445_v62 = vmul.f32 1.442695, %v3170_v56  ;;  %v670_v63 = vmax.f32 %v581_v2, 0.0 }
 0x21b   : > { %1921 = vst.msk [vmem:[%s3166_s30] sm:$0xff] %vm684_vm1, %v1857_v5  ;;  %v1554_v24 = vsel %vm1152_vm2, %v2230_v32, 0.0 }
 0x21c   : > { %2233 = vpow2.f32 %v1445_v62  ;;  %v993_v49 = vpop.f32.mrf.mxu2  ;;  %1635 = vadd.xlane.f32.xlu0 %v1554_v24  ;;  %1281 = vmax.xlane.f32.xlu2 %v1185_v7  ;;  %v589_v24 = vpop.f32.mrf.mxu3  ;;  %v3211_v7 = vld [vmem:[%s3980_s1 + $0x19] ss:$0 sm:$0xff] }
 0x21d   : > { %v3188_v6 = vadd.f32 %v2614_v26, %v993_v49 }
 0x21e   : > { %v2232_v30 = vpop.eup %2231 }
 0x21f   : > { %v1732_v43 = vmul.f32 0.6931472, %v2232_v30  ;;  %v1119_v23 = vmax.f32 %v3188_v6, 0.0  ;;  %v1256_v13 = vpop.xlane.xlu1 %1255  ;;  %v1606_v60 = vpop.xlane.xlu0 %1605 }
 0x220   : > { %v3193_v5 = vsub.f32 %v1105_v45, %v1256_v13  ;;  %2235 = vlog2.f32 %v1606_v60 }
 0x221   : > { %v1858_v32 = vsub.f32 %v2829_v31, %v1732_v43  ;;  %2164 = vmatmul.msk.f32.gmra.mxu2 %vm684_vm1, %v669_v14  ;;  %v1186_v57 = vsel %vm1152_vm2, %v1119_v23, -inf }
 0x222   : > { %v2234_v26 = vpop.eup %2233  ;;  %v1447_v62 = vmul.f32 1.442695, %v3193_v5 }
 0x223   : > { %1922 = vst.msk [vmem:[%s3166_s30 + $0x8] sm:$0xff] %vm684_vm1, %v1858_v32  ;;  %v1555_v45 = vsel %vm1152_vm2, %v2234_v26, 0.0  ;;  %v584_v26 = vadd.f32 %v3075_v58, %v3148_v8 }
 0x224   : > { %2237 = vpow2.f32 %v1447_v62  ;;  %v996_v31 = vpop.f32.mrf.mxu2  ;;  %1283 = vmax.xlane.f32.xlu0 %v1186_v57  ;;  %1637 = vadd.xlane.f32.xlu1 %v1555_v45 }
 0x225   : > { %v3214_v49 = vadd.f32 %v3211_v7, %v996_v31 }
 0x226   : > { %v2236_v14 = vpop.eup %2235 }
 0x227   : > { %v1734_v30 = vmul.f32 0.6931472, %v2236_v14  ;;  %v1120_v43 = vmax.f32 %v3214_v49, 0.0  ;;  %v1608_v13 = vpop.xlane.xlu1 %1607  ;;  %v1258_v60 = vpop.xlane.xlu2 %1257 }
 0x228   : > { %2239 = vlog2.f32 %v1608_v13  ;;  %v3219_v32 = vsub.f32 %v1106_v51, %v1258_v60  ;;  %v671_v51 = vmax.f32 %v584_v26, 0.0  ;;  %v587_v26 = vadd.f32 %v3075_v58, %v3177_v19 }
 0x229   : > { %v1859_v2 = vsub.f32 %v2848_v55, %v1734_v30  ;;  %2165 = vmatmul.msk.f32.gmra.mxu2 %vm684_vm1, %v670_v63  ;;  %v1187_v1 = vsel %vm1152_vm2, %v1120_v43, -inf  ;;  %v592_v63 = vpop.f32.mrf.mxu3 }
 0x22a   : > { %v2238_v62 = vpop.eup %2237  ;;  %v1449_v57 = vmul.f32 1.442695, %v3219_v32 }
 0x22b   : > { %1923 = vst.msk [vmem:[%s3166_s30 + $0x10] sm:$0xff] %vm684_vm1, %v1859_v2  ;;  %v1556_v45 = vsel %vm1152_vm2, %v2238_v62, 0.0 }
 0x22c   : > { %2241 = vpow2.f32 %v1449_v57  ;;  %v999_v55 = vpop.f32.mrf.mxu2  ;;  %1639 = vadd.xlane.f32.xlu2 %v1556_v45  ;;  %1285 = vmax.xlane.f32.xlu1 %v1187_v1 }
 0x22d   : > { %v3235_v8 = vadd.f32 %v3211_v7, %v999_v55 }
 0x22e   : > { %v2240_v31 = vpop.eup %2239 }
 0x22f   : > { %v1736_v14 = vmul.f32 0.6931472, %v2240_v31  ;;  %v1121_v30 = vmax.f32 %v3235_v8, 0.0  ;;  %v1610_v13 = vpop.xlane.xlu2 %1609  ;;  %v1260_v60 = vpop.xlane.xlu0 %1259 }
 0x230   : > { %2243 = vlog2.f32 %v1610_v13  ;;  %v3240_v2 = vsub.f32 %v1107_v39, %v1260_v60  ;;  %v672_v39 = vmax.f32 %v587_v26, 0.0  ;;  %v590_v26 = vadd.f32 %v3075_v58, %v589_v24 }
 0x231   : > { %v1860_v62 = vsub.f32 %v2869_v18, %v1736_v14  ;;  %2166 = vmatmul.msk.f32.gmra.mxu2 %vm684_vm1, %v671_v51  ;;  %v1188_v1 = vsel %vm1152_vm2, %v1121_v30, -inf }
 0x232   : > { %v2242_v57 = vpop.eup %2241  ;;  %v1451_v45 = vmul.f32 1.442695, %v3240_v2 }
 0x233   : > { %1924 = vst.msk [vmem:[%s3166_s30 + $0x18] sm:$0xff] %vm684_vm1, %v1860_v62  ;;  %v1557_v9 = vsel %vm1152_vm2, %v2242_v57, 0.0  ;;  %v595_v62 = vpop.f32.mrf.mxu3 }
 0x234   : > { %2245 = vpow2.f32 %v1451_v45  ;;  %v1002_v18 = vpop.f32.mrf.mxu2  ;;  %1287 = vmax.xlane.f32.xlu2 %v1188_v1  ;;  %1641 = vadd.xlane.f32.xlu0 %v1557_v9 }
 0x235   : > { %v3256_v19 = vadd.f32 %v3211_v7, %v1002_v18 }
 0x236   : > { %v2244_v55 = vpop.eup %2243 }
 0x237   : > { %v1738_v51 = vmul.f32 0.6931472, %v2244_v55  ;;  %v1122_v31 = vmax.f32 %v3256_v19, 0.0  ;;  %v1262_v14 = vpop.xlane.xlu1 %1261  ;;  %v1612_v13 = vpop.xlane.xlu0 %1611 }
 0x238   : > { %v3261_v60 = vsub.f32 %v1108_v4, %v1262_v14  ;;  %2247 = vlog2.f32 %v1612_v13 }
 0x239   : > { %v1861_v57 = vsub.f32 %v2890_v50, %v1738_v51  ;;  %2167 = vmatmul.msk.f32.gmra.mxu2 %vm684_vm1, %v672_v39  ;;  %v1189_v17 = vsel %vm1152_vm2, %v1122_v31, -inf  ;;  %v673_v50 = vmax.f32 %v590_v26, 0.0  ;;  %v593_v26 = vadd.f32 %v3075_v58, %v592_v63 }
 0x23a   : > { %v2246_v45 = vpop.eup %2245  ;;  %v1453_v1 = vmul.f32 1.442695, %v3261_v60 }
 0x23b   : > { %1925 = vst.msk [vmem:[%s3166_s30 + $0x20] sm:$0xff] %vm684_vm1, %v1861_v57  ;;  %v1558_v4 = vsel %vm1152_vm2, %v2246_v45, 0.0 }
 0x23c   : > { %2249 = vpow2.f32 %v1453_v1  ;;  %v1005_v9 = vpop.f32.mrf.mxu2  ;;  %1289 = vmax.xlane.f32.xlu0 %v1189_v17  ;;  %1643 = vadd.xlane.f32.xlu1 %v1558_v4  ;;  %v598_v17 = vpop.f32.mrf.mxu3 }
 0x23d   : > { %v3276_v24 = vadd.f32 %v3211_v7, %v1005_v9 }
 0x23e   : > { %v2248_v18 = vpop.eup %2247 }
 0x23f   : > { %v1740_v39 = vmul.f32 0.6931472, %v2248_v18  ;;  %v1123_v55 = vmax.f32 %v3276_v24, 0.0  ;;  %v1264_v51 = vpop.xlane.xlu2 %1263  ;;  %v1614_v14 = vpop.xlane.xlu1 %1613 }
 0x240   : > { %v3281_v13 = vsub.f32 %v1109_v44, %v1264_v51  ;;  %2251 = vlog2.f32 %v1614_v14  ;;  %v674_v44 = vmax.f32 %v593_v26, 0.0  ;;  %v596_v26 = vadd.f32 %v3075_v58, %v595_v62 }
 0x241   : > { %v1862_v57 = vsub.f32 %v2912_v12, %v1740_v39  ;;  %2168 = vmatmul.msk.f32.gmra.mxu2 %vm684_vm1, %v673_v50  ;;  %v1190_v27 = vsel %vm1152_vm2, %v1123_v55, -inf }
 0x242   : > { %v2250_v45 = vpop.eup %2249  ;;  %v1455_v1 = vmul.f32 1.442695, %v3281_v13  ;;  %v675_v62 = vmax.f32 %v596_v26, 0.0  ;;  %v599_v26 = vadd.f32 %v3075_v58, %v598_v17 }
 0x243   : > { %1926 = vst.msk [vmem:[%s3166_s30 + $0x28] sm:$0xff] %vm684_vm1, %v1862_v57  ;;  %v1559_v4 = vsel %vm1152_vm2, %v2250_v45, 0.0 }
 0x244   : > { %2253 = vpow2.f32 %v1455_v1  ;;  %v1008_v12 = vpop.f32.mrf.mxu2  ;;  %1645 = vadd.xlane.f32.xlu2 %v1559_v4  ;;  %1291 = vmax.xlane.f32.xlu1 %v1190_v27 }
 0x245   : > { %v3296_v63 = vadd.f32 %v3211_v7, %v1008_v12 }
 0x246   : > { %v2252_v9 = vpop.eup %2251 }
 0x247   : > { %v1742_v50 = vmul.f32 0.6931472, %v2252_v9  ;;  %v1124_v18 = vmax.f32 %v3296_v63, 0.0  ;;  %v1616_v39 = vpop.xlane.xlu2 %1615  ;;  %v1266_v51 = vpop.xlane.xlu0 %1265 }
 0x248   : > { %2255 = vlog2.f32 %v1616_v39  ;;  %v3301_v14 = vsub.f32 %v1110_v22, %v1266_v51 }
 0x249   : > { %v1863_v57 = vsub.f32 %v2934_v46, %v1742_v50  ;;  %2169 = vmatmul.msk.f32.gmra.mxu2 %vm684_vm1, %v674_v44  ;;  %v1191_v4 = vsel %vm1152_vm2, %v1124_v18, -inf  ;;  %v601_v46 = vpop.f32.mrf.mxu3 }
 0x24a   : > { %v2254_v45 = vpop.eup %2253  ;;  %v1457_v1 = vmul.f32 1.442695, %v3301_v14 }
 0x24b   : > { %1927 = vst.msk [vmem:[%s3166_s30 + $0x30] sm:$0xff] %vm684_vm1, %v1863_v57  ;;  %v1560_v38 = vsel %vm1152_vm2, %v2254_v45, 0.0 }
 0x24c   : > { %2257 = vpow2.f32 %v1457_v1  ;;  %v1011_v22 = vpop.f32.mrf.mxu2  ;;  %1293 = vmax.xlane.f32.xlu2 %v1191_v4  ;;  %1647 = vadd.xlane.f32.xlu0 %v1560_v38 }
 0x24d   : > { %v3316_v27 = vadd.f32 %v3211_v7, %v1011_v22 }
 0x24e   : > { %v2256_v12 = vpop.eup %2255 }
 0x24f   : > { %v1744_v44 = vmul.f32 0.6931472, %v2256_v12  ;;  %v1125_v9 = vmax.f32 %v3316_v27, 0.0  ;;  %v1268_v50 = vpop.xlane.xlu1 %1267  ;;  %v1618_v39 = vpop.xlane.xlu0 %1617 }
 0x250   : > { %v3321_v51 = vsub.f32 %v1111_v61, %v1268_v50  ;;  %2259 = vlog2.f32 %v1618_v39 }
 0x251   : > { %v1864_v57 = vsub.f32 %v2956_v15, %v1744_v44  ;;  %2170 = vmatmul.msk.f32.gmra.mxu2 %vm684_vm1, %v675_v62  ;;  %v1192_v4 = vsel %vm1152_vm2, %v1125_v9, -inf  ;;  %v676_v15 = vmax.f32 %v599_v26, 0.0  ;;  %v604_v22 = vpop.f32.mrf.mxu3  ;;  %v602_v26 = vadd.f32 %v3075_v58, %v601_v46 }
 0x252   : > { %v2258_v45 = vpop.eup %2257  ;;  %v1459_v1 = vmul.f32 1.442695, %v3321_v51 }
 0x253   : > { %1928 = vst.msk [vmem:[%s3166_s30 + $0x38] sm:$0xff] %vm684_vm1, %v1864_v57  ;;  %v1561_v41 = vsel %vm1152_vm2, %v2258_v45, 0.0 }
 0x254   : > { %2261 = vpow2.f32 %v1459_v1  ;;  %v1014_v61 = vpop.f32.mrf.mxu2  ;;  %1295 = vmax.xlane.f32.xlu0 %v1192_v4  ;;  %1649 = vadd.xlane.f32.xlu1 %v1561_v41 }
 0x255   : > { %v3336_v17 = vadd.f32 %v3211_v7, %v1014_v61 }
 0x256   : > { %v2260_v38 = vpop.eup %2259 }
 0x257   : > { %v1746_v62 = vmul.f32 0.6931472, %v2260_v38  ;;  %v1126_v12 = vmax.f32 %v3336_v17, 0.0  ;;  %v1270_v44 = vpop.xlane.xlu2 %1269  ;;  %v1620_v50 = vpop.xlane.xlu1 %1619 }
 0x258   : > { %v3341_v39 = vsub.f32 %v1112_v34, %v1270_v44  ;;  %2263 = vlog2.f32 %v1620_v50 }
 0x259   : > { %v1865_v57 = vsub.f32 %v2978_v54, %v1746_v62  ;;  %2171 = vmatmul.msk.f32.gmra.mxu2 %vm684_vm1, %v676_v15  ;;  %v1193_v28 = vsel %vm1152_vm2, %v1126_v12, -inf  ;;  %v677_v54 = vmax.f32 %v602_v26, 0.0  ;;  %v607_v50 = vpop.f32.mrf.mxu3  ;;  %v605_v26 = vadd.f32 %v3075_v58, %v604_v22 }
 0x25a   : > { %v2262_v45 = vpop.eup %2261  ;;  %v1461_v1 = vmul.f32 1.442695, %v3341_v39 }
 0x25b   : > { %1929 = vst.msk [vmem:[%s3166_s30 + $0x40] sm:$0xff] %vm684_vm1, %v1865_v57  ;;  %v1562_v4 = vsel %vm1152_vm2, %v2262_v45, 0.0 }
 0x25c   : > { %2265 = vpow2.f32 %v1461_v1  ;;  %v1017_v34 = vpop.f32.mrf.mxu2  ;;  %1651 = vadd.xlane.f32.xlu2 %v1562_v4  ;;  %1297 = vmax.xlane.f32.xlu1 %v1193_v28 }
 0x25d   : > { %v3356_v46 = vadd.f32 %v3211_v7, %v1017_v34 }
 0x25e   : > { %v2264_v41 = vpop.eup %2263 }
 0x25f   : > { %v1748_v61 = vmul.f32 0.6931472, %v2264_v41  ;;  %v1127_v15 = vmax.f32 %v3356_v46, 0.0  ;;  %v1622_v38 = vpop.xlane.xlu2 %1621  ;;  %v1272_v62 = vpop.xlane.xlu0 %1271 }
 0x260   : > { %2267 = vlog2.f32 %v1622_v38  ;;  %v3361_v44 = vsub.f32 %v1113_v10, %v1272_v62 }
 0x261   : > { %v1866_v57 = vsub.f32 %v3000_v35, %v1748_v61  ;;  %2172 = vmatmul.msk.f32.gmra.mxu2 %vm684_vm1, %v677_v54  ;;  %v1194_v40 = vsel %vm1152_vm2, %v1127_v15, -inf  ;;  %v678_v35 = vmax.f32 %v605_v26, 0.0 }
 0x262   : > { %v2266_v45 = vpop.eup %2265  ;;  %v1463_v1 = vmul.f32 1.442695, %v3361_v44 }
 0x263   : > { %1930 = vst.msk [vmem:[%s3166_s30 + $0x48] sm:$0xff] %vm684_vm1, %v1866_v57  ;;  %v1563_v4 = vsel %vm1152_vm2, %v2266_v45, 0.0  ;;  %v608_v57 = vadd.f32 %v3075_v58, %v607_v50 }
 0x264   : > { %2269 = vpow2.f32 %v1463_v1  ;;  %v1020_v10 = vpop.f32.mrf.mxu2  ;;  %1653 = vadd.xlane.f32.xlu0 %v1563_v4  ;;  %1299 = vmax.xlane.f32.xlu2 %v1194_v40  ;;  %v610_v1 = vpop.f32.mrf.mxu3 }
 0x265   : > { %v3376_v22 = vadd.f32 %v3211_v7, %v1020_v10  ;;  %v679_v50 = vmax.f32 %v608_v57, 0.0 }
 0x266   : > { %v2268_v28 = vpop.eup %2267 }
 0x267   : > { %v1750_v34 = vmul.f32 0.6931472, %v2268_v28  ;;  %v1128_v54 = vmax.f32 %v3376_v22, 0.0  ;;  %v1274_v41 = vpop.xlane.xlu1 %1273  ;;  %v1624_v61 = vpop.xlane.xlu0 %1623 }
 0x268   : > { %v3381_v38 = vsub.f32 %v1114_v52, %v1274_v41  ;;  %2271 = vlog2.f32 %v1624_v61 }
 0x269   : > { %v1867_v62 = vsub.f32 %v3020_v20, %v1750_v34  ;;  %2173 = vmatmul.msk.f32.gmra.mxu2 %vm684_vm1, %v678_v35  ;;  %v1195_v42 = vsel %vm1152_vm2, %v1128_v54, -inf }
 0x26a   : > { %v2270_v26 = vpop.eup %2269  ;;  %v1465_v45 = vmul.f32 1.442695, %v3381_v38 }
 0x26b   : > { %1931 = vst.msk [vmem:[%s3166_s30 + $0x50] sm:$0xff] %vm684_vm1, %v1867_v62  ;;  %v1564_v52 = vsel %vm1152_vm2, %v2270_v26, 0.0  ;;  %v611_v62 = vadd.f32 %v3075_v58, %v610_v1 }
 0x26c   : > { %2273 = vpow2.f32 %v1465_v45  ;;  %v1023_v20 = vpop.f32.mrf.mxu2  ;;  %1301 = vmax.xlane.f32.xlu0 %v1195_v42  ;;  %1655 = vadd.xlane.f32.xlu1 %v1564_v52 }
 0x26d   : > { %v3396_v4 = vadd.f32 %v3211_v7, %v1023_v20  ;;  %v680_v1 = vmax.f32 %v611_v62, 0.0 }
 0x26e   : > { %v2272_v40 = vpop.eup %2271 }
 0x26f   : > { %v1752_v10 = vmul.f32 0.6931472, %v2272_v40  ;;  %v1129_v35 = vmax.f32 %v3396_v4, 0.0  ;;  %v1276_v28 = vpop.xlane.xlu2 %1275  ;;  %v1626_v34 = vpop.xlane.xlu1 %1625 }
 0x270   : > { %v3401_v41 = vsub.f32 %v1115_v48, %v1276_v28  ;;  %2275 = vlog2.f32 %v1626_v34  ;;  %v3984_v28 = vmax.f32 %v3109_v47, 0.0 }
 0x271   : > { %v1868_v61 = vsub.f32 %v3040_v59, %v1752_v10  ;;  %2174 = vmatmul.msk.f32.gmra.mxu2 %vm684_vm1, %v679_v50  ;;  %v1196_v33 = vsel %vm1152_vm2, %v1129_v35, -inf  ;;  %v613_v59 = vpop.f32.mrf.mxu3 }
 0x272   : > { %v2274_v57 = vpop.eup %2273  ;;  %v1467_v26 = vmul.f32 1.442695, %v3401_v41  ;;  %v614_v62 = vadd.f32 %v3075_v58, %v613_v59 }
 0x273   : > { %1932 = vst.msk [vmem:[%s3166_s30 + $0x58] sm:$0xff] %vm684_vm1, %v1868_v61  ;;  %v1565_v45 = vsel %vm1152_vm2, %v2274_v57, 0.0 }
 0x274   : > { %2277 = vpow2.f32 %v1467_v26  ;;  %v1026_v48 = vpop.f32.mrf.mxu2  ;;  %1657 = vadd.xlane.f32.xlu2 %v1565_v45  ;;  %1303 = vmax.xlane.f32.xlu1 %v1196_v33 }
 0x275   : > { %v3416_v42 = vadd.f32 %v3211_v7, %v1026_v48 }
 0x276   : > { %v2276_v52 = vpop.eup %2275 }
 0x277   : > { %v1754_v20 = vmul.f32 0.6931472, %v2276_v52  ;;  %v1130_v50 = vmax.f32 %v3416_v42, 0.0  ;;  %v1628_v40 = vpop.xlane.xlu2 %1627  ;;  %v1278_v10 = vpop.xlane.xlu0 %1277 }
 0x278   : > { %2279 = vlog2.f32 %v1628_v40  ;;  %v3421_v34 = vsub.f32 %v3984_v28, %v1278_v10  ;;  %v3985_v28 = vmax.f32 %v3128_v0, 0.0 }
 0x279   : > { %v1869_v61 = vsub.f32 %v3058_v37, %v1754_v20  ;;  %2175 = vmatmul.msk.f32.gmra.mxu2 %vm684_vm1, %v680_v1  ;;  %v1197_v47 = vsel %vm1152_vm2, %v1130_v50, -inf  ;;  %v681_v37 = vmax.f32 %v614_v62, 0.0  ;;  %v616_v1 = vpop.f32.mrf.mxu3 }
 0x27a   : > { %v2278_v57 = vpop.eup %2277  ;;  %v1469_v26 = vmul.f32 1.442695, %v3421_v34  ;;  %v617_v62 = vadd.f32 %v3075_v58, %v616_v1 }
 0x27b   : > { %1933 = vst.msk [vmem:[%s3166_s30 + $0x60] sm:$0xff] %vm684_vm1, %v1869_v61  ;;  %v1566_v45 = vsel %vm1152_vm2, %v2278_v57, 0.0 }
 0x27c   : > { %2281 = vpow2.f32 %v1469_v26  ;;  %v1029_v33 = vpop.f32.mrf.mxu2  ;;  %1659 = vadd.xlane.f32.xlu0 %v1566_v45  ;;  %1305 = vmax.xlane.f32.xlu2 %v1197_v47 }
 0x27d   : > { %v3436_v48 = vadd.f32 %v3211_v7, %v1029_v33  ;;  %v682_v33 = vmax.f32 %v617_v62, 0.0 }
 0x27e   : > { %v2280_v59 = vpop.eup %2279 }
 0x27f   : > { %v1756_v52 = vmul.f32 0.6931472, %v2280_v59  ;;  %v1131_v20 = vmax.f32 %v3436_v48, 0.0  ;;  %v1280_v40 = vpop.xlane.xlu1 %1279  ;;  %v1630_v10 = vpop.xlane.xlu0 %1629  ;;  %v2451_v48 = vld [vmem:[%s3980_s1 + $0x19] ss:$0 sm:$0xff] }
 0x280   : > { %v3441_v61 = vsub.f32 %v3985_v28, %v1280_v40  ;;  %2283 = vlog2.f32 %v1630_v10 }
 0x281   : > { %v1870_v57 = vsub.f32 %v3080_v3, %v1756_v52  ;;  %2176 = vmatmul.msk.f32.gmra.mxu2 %vm684_vm1, %v681_v37  ;;  %v1198_v47 = vsel %vm1152_vm2, %v1131_v20, -inf }
 0x282   : > { %v2282_v26 = vpop.eup %2281  ;;  %v1471_v45 = vmul.f32 1.442695, %v3441_v61 }
 0x283   : > { %1934 = vst.msk [vmem:[%s3166_s30 + $0x68] sm:$0xff] %vm684_vm1, %v1870_v57  ;;  %v1567_v0 = vsel %vm1152_vm2, %v2282_v26, 0.0 }
 0x284   : > { %2285 = vpow2.f32 %v1471_v45  ;;  %v1032_v3 = vpop.f32.mrf.mxu2  ;;  %1307 = vmax.xlane.f32.xlu0 %v1198_v47  ;;  %1661 = vadd.xlane.f32.xlu1 %v1567_v0 }
 0x285   : > { %v3456_v58 = vadd.f32 %v3211_v7, %v1032_v3 }
 0x286   : > { %v2284_v37 = vpop.eup %2283 }
 0x287   : > { %v1758_v59 = vmul.f32 0.6931472, %v2284_v37  ;;  %v1132_v1 = vmax.f32 %v3456_v58, 0.0  ;;  %v1634_v52 = vpop.xlane.xlu2 %1633  ;;  %v1632_v40 = vpop.xlane.xlu1 %1631 }
 0x288   : > { %2287 = vlog2.f32 %v1634_v52 }
 0x289   : > { %v1871_v10 = vsub.f32 %v3097_v16, %v1758_v59  ;;  %2289 = vlog2.f32 %v1632_v40  ;;  %2177 = vmatmul.msk.f32.gmra.mxu2 %vm684_vm1, %v682_v33  ;;  %v1199_v62 = vsel %vm1152_vm2, %v1132_v1, -inf }
 0x28a   : > { %v2286_v28 = vpop.eup %2285 }
 0x28b   : > { %1935 = vst.msk [vmem:[%s3166_s30 + $0x70] sm:$0xff] %vm684_vm1, %v1871_v10  ;;  %v1568_v57 = vsel %vm1152_vm2, %v2286_v28, 0.0 }
 0x28c   : > { %v1035_v26 = vpop.f32.mrf.mxu2  ;;  %1663 = vadd.xlane.f32.xlu2 %v1568_v57  ;;  %1309 = vmax.xlane.f32.xlu1 %v1199_v62 }
 0x28d   : > { %v3470_v16 = vadd.f32 %v3211_v7, %v1035_v26 }
 0x28e   : > { %v2288_v45 = vpop.eup %2287 }
 0x28f   : > { %v2290_v47 = vpop.eup %2289  ;;  %v1762_v0 = vmul.f32 0.6931472, %v2288_v45  ;;  %v1133_v3 = vmax.f32 %v3470_v16, 0.0  ;;  %v1282_v33 = vpop.xlane.xlu2 %1281 }
 0x290   : > { %v1636_v37 = vpop.xlane.xlu0 %1635  ;;  %v1760_v59 = vmul.f32 0.6931472, %v2290_v47  ;;  %v3475_v52 = vsub.f32 %v1118_v25, %v1282_v33 }
 0x291   : > { %2291 = vlog2.f32 %v1636_v37  ;;  %v1873_v40 = vsub.f32 %v3132_v53, %v1762_v0  ;;  %v1200_v57 = vsel %vm1152_vm2, %v1133_v3, -inf }
 0x292   : > { %v1872_v10 = vsub.f32 %v3116_v36, %v1760_v59  ;;  %v1473_v28 = vmul.f32 1.442695, %v3475_v52 }
 0x293   : > { %1937 = vst.msk [vmem:[%s3166_s30 + $0x80] sm:$0xff] %vm684_vm1, %v1873_v40 }
 0x294   : > { %1936 = vst.msk [vmem:[%s3166_s30 + $0x78] sm:$0xff] %vm684_vm1, %v1872_v10  ;;  %v1038_v21 = vpop.f32.mrf.mxu2  ;;  %1311 = vmax.xlane.f32.xlu2 %v1200_v57  ;;  %2293 = vpow2.f32 %v1473_v28 }
 0x295   : > { %v3489_v25 = vadd.f32 %v3211_v7, %v1038_v21 }
 0x297   : > { %v2292_v53 = vpop.eup %2291  ;;  %v1134_v62 = vmax.f32 %v3489_v25, 0.0  ;;  %v1638_v26 = vpop.xlane.xlu1 %1637 }
 0x298   : > { %v1764_v36 = vmul.f32 0.6931472, %v2292_v53  ;;  %v1284_v45 = vpop.xlane.xlu0 %1283  ;;  %2295 = vlog2.f32 %v1638_v26 }
 0x299   : > { %v3494_v47 = vsub.f32 %v1119_v23, %v1284_v45  ;;  %v1201_v33 = vsel %vm1152_vm2, %v1134_v62, -inf }
 0x29a   : > { %v1874_v0 = vsub.f32 %v3146_v11, %v1764_v36  ;;  %1313 = vmax.xlane.f32.xlu0 %v1201_v33  ;;  %v2294_v40 = vpop.eup %2293 }
 0x29b   : > { %v1475_v37 = vmul.f32 1.442695, %v3494_v47  ;;  %v1569_v36 = vsel %vm1152_vm2, %v2294_v40, 0.0 }
 0x29c   : > { %1938 = vst.msk [vmem:[%s3166_s30 + $0x88] sm:$0xff] %vm684_vm1, %v1874_v0  ;;  %v1041_v59 = vpop.f32.mrf.mxu2 }
 0x29d   : > { %v3505_v10 = vadd.f32 %v3211_v7, %v1041_v59  ;;  %2297 = vpow2.f32 %v1475_v37 }
 0x29e   : > { %v2296_v6 = vpop.eup %2295 }
 0x29f   : > { %v1766_v23 = vmul.f32 0.6931472, %v2296_v6  ;;  %v1135_v11 = vmax.f32 %v3505_v10, 0.0  ;;  %v1640_v28 = vpop.xlane.xlu2 %1639  ;;  %v1286_v57 = vpop.xlane.xlu1 %1285 }
 0x2a0   : > { %2299 = vlog2.f32 %v1640_v28  ;;  %v3510_v21 = vsub.f32 %v1120_v43, %v1286_v57 }
 0x2a1   : > { %v1875_v53 = vsub.f32 %v3170_v56, %v1766_v23  ;;  %v1202_v26 = vsel %vm1152_vm2, %v1135_v11, -inf }
 0x2a2   : > { %1665 = vadd.xlane.f32.xlu0 %v1569_v36  ;;  %1315 = vmax.xlane.f32.xlu1 %v1202_v26  ;;  %v1477_v45 = vmul.f32 1.442695, %v3510_v21 }
 0x2a3   : > { %1939 = vst.msk [vmem:[%s3166_s30 + $0x90] sm:$0xff] %vm684_vm1, %v1875_v53  ;;  %v2298_v49 = vpop.eup %2297 }
 0x2a4   : > { %v1044_v0 = vpop.f32.mrf.mxu2  ;;  %2301 = vpow2.f32 %v1477_v45  ;;  %v1570_v57 = vsel %vm1152_vm2, %v2298_v49, 0.0 }
 0x2a5   : > { %v3523_v43 = vadd.f32 %v3211_v7, %v1044_v0 }
 0x2a6   : > { %v2300_v56 = vpop.eup %2299 }
 0x2a7   : > { %v1768_v33 = vmul.f32 0.6931472, %v2300_v56  ;;  %v1136_v37 = vmax.f32 %v3523_v43, 0.0  ;;  %v1288_v59 = vpop.xlane.xlu2 %1287  ;;  %v1642_v40 = vpop.xlane.xlu0 %1641 }
 0x2a8   : > { %v3528_v6 = vsub.f32 %v1121_v30, %v1288_v59  ;;  %2303 = vlog2.f32 %v1642_v40 }
 0x2a9   : > { %v1876_v23 = vsub.f32 %v3193_v5, %v1768_v33  ;;  %v1203_v28 = vsel %vm1152_vm2, %v1136_v37, -inf }
 0x2aa   : > { %1317 = vmax.xlane.f32.xlu2 %v1203_v28  ;;  %1667 = vadd.xlane.f32.xlu1 %v1570_v57  ;;  %v1479_v53 = vmul.f32 1.442695, %v3528_v6  ;;  %v2302_v30 = vpop.eup %2301 }
 0x2ab   : > { %1940 = vst.msk [vmem:[%s3166_s30 + $0x98] sm:$0xff] %vm684_vm1, %v1876_v23  ;;  %v1571_v40 = vsel %vm1152_vm2, %v2302_v30, 0.0 }
 0x2ac   : > { %v1047_v8 = vpop.f32.mrf.mxu2  ;;  %2305 = vpow2.f32 %v1479_v53 }
 0x2ad   : > { %v3541_v36 = vadd.f32 %v3211_v7, %v1047_v8 }
 0x2ae   : > { %v2304_v5 = vpop.eup %2303 }
 0x2af   : > { %v1770_v26 = vmul.f32 0.6931472, %v2304_v5  ;;  %v1137_v45 = vmax.f32 %v3541_v36, 0.0  ;;  %v1644_v0 = vpop.xlane.xlu1 %1643  ;;  %v1290_v56 = vpop.xlane.xlu0 %1289 }
 0x2b0   : > { %2307 = vlog2.f32 %v1644_v0  ;;  %v3546_v49 = vsub.f32 %v1122_v31, %v1290_v56 }
 0x2b1   : > { %v1877_v33 = vsub.f32 %v3219_v32, %v1770_v26  ;;  %v1204_v59 = vsel %vm1152_vm2, %v1137_v45, -inf }
 0x2b2   : > { %1319 = vmax.xlane.f32.xlu0 %v1204_v59  ;;  %1669 = vadd.xlane.f32.xlu2 %v1571_v40  ;;  %v1481_v23 = vmul.f32 1.442695, %v3546_v49  ;;  %v2306_v19 = vpop.eup %2305 }
 0x2b3   : > { %1941 = vst.msk [vmem:[%s3166_s30 + $0xa0] sm:$0xff] %vm684_vm1, %v1877_v33  ;;  %v1572_v0 = vsel %vm1152_vm2, %v2306_v19, 0.0 }
 0x2b4   : > { %v1050_v28 = vpop.f32.mrf.mxu2  ;;  %2309 = vpow2.f32 %v1481_v23 }
 0x2b5   : > { %v3559_v31 = vadd.f32 %v3211_v7, %v1050_v28 }
 0x2b6   : > { %v2308_v32 = vpop.eup %2307 }
 0x2b7   : > { %v1772_v57 = vmul.f32 0.6931472, %v2308_v32  ;;  %v1138_v53 = vmax.f32 %v3559_v31, 0.0  ;;  %v1646_v8 = vpop.xlane.xlu2 %1645  ;;  %v1292_v5 = vpop.xlane.xlu1 %1291 }
 0x2b8   : > { %2311 = vlog2.f32 %v1646_v8  ;;  %v3564_v30 = vsub.f32 %v1123_v55, %v1292_v5 }
 0x2b9   : > { %v1878_v26 = vsub.f32 %v3240_v2, %v1772_v57  ;;  %v1205_v56 = vsel %vm1152_vm2, %v1138_v53, -inf }
 0x2ba   : > { %1671 = vadd.xlane.f32.xlu0 %v1572_v0  ;;  %1321 = vmax.xlane.f32.xlu1 %v1205_v56  ;;  %v1483_v33 = vmul.f32 1.442695, %v3564_v30  ;;  %v2310_v24 = vpop.eup %2309 }
 0x2bb   : > { %1942 = vst.msk [vmem:[%s3166_s30 + $0xa8] sm:$0xff] %vm684_vm1, %v1878_v26  ;;  %v1573_v5 = vsel %vm1152_vm2, %v2310_v24, 0.0 }
 0x2bc   : > { %v1053_v59 = vpop.f32.mrf.mxu2  ;;  %2313 = vpow2.f32 %v1483_v33 }
 0x2bd   : > { %v3577_v55 = vadd.f32 %v3211_v7, %v1053_v59 }
 0x2be   : > { %v2312_v2 = vpop.eup %2311 }
 0x2bf   : > { %v1774_v40 = vmul.f32 0.6931472, %v2312_v2  ;;  %v1139_v23 = vmax.f32 %v3577_v55, 0.0  ;;  %v1294_v28 = vpop.xlane.xlu2 %1293  ;;  %v1648_v19 = vpop.xlane.xlu0 %1647 }
 0x2c0   : > { %v3582_v32 = vsub.f32 %v1124_v18, %v1294_v28  ;;  %2315 = vlog2.f32 %v1648_v19 }
 0x2c1   : > { %v1879_v57 = vsub.f32 %v3261_v60, %v1774_v40  ;;  %v1206_v8 = vsel %vm1152_vm2, %v1139_v23, -inf }
 0x2c2   : > { %1323 = vmax.xlane.f32.xlu2 %v1206_v8  ;;  %1673 = vadd.xlane.f32.xlu1 %v1573_v5  ;;  %v1485_v26 = vmul.f32 1.442695, %v3582_v32  ;;  %v2314_v18 = vpop.eup %2313 }
 0x2c3   : > { %1943 = vst.msk [vmem:[%s3166_s30 + $0xb0] sm:$0xff] %vm684_vm1, %v1879_v57  ;;  %v1574_v19 = vsel %vm1152_vm2, %v2314_v18, 0.0 }
 0x2c4   : > { %v1056_v63 = vpop.f32.mrf.mxu2  ;;  %2317 = vpow2.f32 %v1485_v26 }
 0x2c5   : > { %v3595_v0 = vadd.f32 %v3211_v7, %v1056_v63 }
 0x2c6   : > { %v2316_v60 = vpop.eup %2315 }
 0x2c7   : > { %v1776_v56 = vmul.f32 0.6931472, %v2316_v60  ;;  %v1140_v33 = vmax.f32 %v3595_v0, 0.0  ;;  %v1650_v59 = vpop.xlane.xlu1 %1649  ;;  %v1296_v2 = vpop.xlane.xlu0 %1295 }
 0x2c8   : > { %2319 = vlog2.f32 %v1650_v59  ;;  %v3600_v24 = vsub.f32 %v1125_v9, %v1296_v2 }
 0x2c9   : > { %v1880_v40 = vsub.f32 %v3281_v13, %v1776_v56  ;;  %v1207_v28 = vsel %vm1152_vm2, %v1140_v33, -inf }
 0x2ca   : > { %1325 = vmax.xlane.f32.xlu0 %v1207_v28  ;;  %1675 = vadd.xlane.f32.xlu2 %v1574_v19  ;;  %v1487_v57 = vmul.f32 1.442695, %v3600_v24  ;;  %v2318_v27 = vpop.eup %2317 }
 0x2cb   : > { %1944 = vst.msk [vmem:[%s3166_s30 + $0xb8] sm:$0xff] %vm684_vm1, %v1880_v40  ;;  %v1575_v59 = vsel %vm1152_vm2, %v2318_v27, 0.0 }
 0x2cc   : > { %v1059_v8 = vpop.f32.mrf.mxu2  ;;  %2321 = vpow2.f32 %v1487_v57 }
 0x2cd   : > { %v3613_v9 = vadd.f32 %v3211_v7, %v1059_v8 }
 0x2ce   : > { %v2320_v13 = vpop.eup %2319 }
 0x2cf   : > { %v1778_v5 = vmul.f32 0.6931472, %v2320_v13  ;;  %v1141_v26 = vmax.f32 %v3613_v9, 0.0  ;;  %v1652_v63 = vpop.xlane.xlu2 %1651  ;;  %v1298_v60 = vpop.xlane.xlu1 %1297 }
 0x2d0   : > { %2323 = vlog2.f32 %v1652_v63  ;;  %v3618_v18 = vsub.f32 %v1126_v12, %v1298_v60 }
 0x2d1   : > { %v1881_v56 = vsub.f32 %v3301_v14, %v1778_v5  ;;  %v1208_v2 = vsel %vm1152_vm2, %v1141_v26, -inf }
 0x2d2   : > { %1677 = vadd.xlane.f32.xlu0 %v1575_v59  ;;  %1327 = vmax.xlane.f32.xlu1 %v1208_v2  ;;  %v1489_v40 = vmul.f32 1.442695, %v3618_v18  ;;  %v2322_v17 = vpop.eup %2321 }
 0x2d3   : > { %1945 = vst.msk [vmem:[%s3166_s30 + $0xc0] sm:$0xff] %vm684_vm1, %v1881_v56  ;;  %v1576_v60 = vsel %vm1152_vm2, %v2322_v17, 0.0 }
 0x2d4   : > { %v1062_v28 = vpop.f32.mrf.mxu2  ;;  %2325 = vpow2.f32 %v1489_v40 }
 0x2d5   : > { %v3631_v12 = vadd.f32 %v3211_v7, %v1062_v28 }
 0x2d6   : > { %v2324_v14 = vpop.eup %2323 }
 0x2d7   : > { %v1780_v19 = vmul.f32 0.6931472, %v2324_v14  ;;  %v1142_v57 = vmax.f32 %v3631_v12, 0.0  ;;  %v1300_v8 = vpop.xlane.xlu2 %1299  ;;  %v1654_v27 = vpop.xlane.xlu0 %1653 }
 0x2d8   : > { %v3636_v13 = vsub.f32 %v1127_v15, %v1300_v8  ;;  %2327 = vlog2.f32 %v1654_v27 }
 0x2d9   : > { %v1882_v5 = vsub.f32 %v3321_v51, %v1780_v19  ;;  %v1209_v63 = vsel %vm1152_vm2, %v1142_v57, -inf }
 0x2da   : > { %1329 = vmax.xlane.f32.xlu2 %v1209_v63  ;;  %1679 = vadd.xlane.f32.xlu1 %v1576_v60  ;;  %v1491_v56 = vmul.f32 1.442695, %v3636_v13  ;;  %v2326_v15 = vpop.eup %2325 }
 0x2db   : > { %1946 = vst.msk [vmem:[%s3166_s30 + $0xc8] sm:$0xff] %vm684_vm1, %v1882_v5  ;;  %v1577_v27 = vsel %vm1152_vm2, %v2326_v15, 0.0 }
 0x2dc   : > { %v1065_v46 = vpop.f32.mrf.mxu2  ;;  %2329 = vpow2.f32 %v1491_v56 }
 0x2dd   : > { %v3649_v59 = vadd.f32 %v3211_v7, %v1065_v46 }
 0x2de   : > { %v2328_v51 = vpop.eup %2327 }
 0x2df   : > { %v1782_v2 = vmul.f32 0.6931472, %v2328_v51  ;;  %v1143_v40 = vmax.f32 %v3649_v59, 0.0  ;;  %v1656_v28 = vpop.xlane.xlu1 %1655  ;;  %v1302_v14 = vpop.xlane.xlu0 %1301 }
 0x2e0   : > { %2331 = vlog2.f32 %v1656_v28  ;;  %v3654_v17 = vsub.f32 %v1128_v54, %v1302_v14 }
 0x2e1   : > { %v1883_v19 = vsub.f32 %v3341_v39, %v1782_v2  ;;  %v1210_v8 = vsel %vm1152_vm2, %v1143_v40, -inf }
 0x2e2   : > { %1331 = vmax.xlane.f32.xlu0 %v1210_v8  ;;  %1681 = vadd.xlane.f32.xlu2 %v1577_v27  ;;  %v1493_v5 = vmul.f32 1.442695, %v3654_v17  ;;  %v2330_v54 = vpop.eup %2329 }
 0x2e3   : > { %1947 = vst.msk [vmem:[%s3166_s30 + $0xd0] sm:$0xff] %vm684_vm1, %v1883_v19  ;;  %v1578_v51 = vsel %vm1152_vm2, %v2330_v54, 0.0 }
 0x2e4   : > { %v1068_v22 = vpop.f32.mrf.mxu2  ;;  %2333 = vpow2.f32 %v1493_v5 }
 0x2e5   : > { %v3667_v63 = vadd.f32 %v3211_v7, %v1068_v22 }
 0x2e6   : > { %v2332_v39 = vpop.eup %2331 }
 0x2e7   : > { %v1784_v60 = vmul.f32 0.6931472, %v2332_v39  ;;  %v1144_v56 = vmax.f32 %v3667_v63, 0.0  ;;  %v1658_v46 = vpop.xlane.xlu2 %1657  ;;  %v1304_v27 = vpop.xlane.xlu1 %1303 }
 0x2e8   : > { %2335 = vlog2.f32 %v1658_v46 }
 0x2e9   : > { %v1884_v15 = vsub.f32 %v3361_v44, %v1784_v60  ;;  %v1211_v2 = vsel %vm1152_vm2, %v1144_v56, -inf }
 0x2ea   : > { %1683 = vadd.xlane.f32.xlu0 %v1578_v51  ;;  %1333 = vmax.xlane.f32.xlu1 %v1211_v2  ;;  %v2334_v14 = vpop.eup %2333 }
 0x2eb   : > { %1948 = vst.msk [vmem:[%s3166_s30 + $0xd8] sm:$0xff] %vm684_vm1, %v1884_v15  ;;  %v1579_v60 = vsel %vm1152_vm2, %v2334_v14, 0.0 }
 0x2ec   : > { %v1071_v28 = vpop.f32.mrf.mxu2 }
 0x2ed   : > { %v3680_v19 = vadd.f32 %v3211_v7, %v1071_v28 }
 0x2ee   : > { %v2336_v8 = vpop.eup %2335 }
 0x2ef   : > { %v1786_v44 = vmul.f32 0.6931472, %v2336_v8  ;;  %v1145_v5 = vmax.f32 %v3680_v19, 0.0  ;;  %v1660_v22 = vpop.xlane.xlu0 %1659  ;;  %v1306_v2 = vpop.xlane.xlu2 %1305 }
 0x2f0   : > { %2337 = vlog2.f32 %v1660_v22 }
 0x2f1   : > { %v1885_v54 = vsub.f32 %v3381_v38, %v1786_v44  ;;  %v1212_v39 = vsel %vm1152_vm2, %v1145_v5, -inf }
 0x2f2   : > { %1335 = vmax.xlane.f32.xlu2 %v1212_v39  ;;  %1685 = vadd.xlane.f32.xlu1 %v1579_v60 }
 0x2f3   : > { %1949 = vst.msk [vmem:[%s3166_s30 + $0xe0] sm:$0xff] %vm684_vm1, %v1885_v54 }
 0x2f4   : > { %v1074_v46 = vpop.f32.mrf.mxu2 }
 0x2f5   : > { %v3693_v15 = vadd.f32 %v3211_v7, %v1074_v46 }
 0x2f6   : > { %v2338_v51 = vpop.eup %2337 }
 0x2f7   : > { %v1788_v38 = vmul.f32 0.6931472, %v2338_v51  ;;  %v1146_v28 = vmax.f32 %v3693_v15, 0.0  ;;  %v1662_v8 = vpop.xlane.xlu1 %1661  ;;  %v1308_v44 = vpop.xlane.xlu0 %1307 }
 0x2f8   : > { %2339 = vlog2.f32 %v1662_v8  ;;  %v3698_v14 = vsub.f32 %v1131_v20, %v1308_v44 }
 0x2f9   : > { %v1886_v22 = vsub.f32 %v3401_v41, %v1788_v38  ;;  %v1213_v7 = vsel %vm1152_vm2, %v1146_v28, -inf  ;;  %v3716_v38 = vsub.f32 %v1129_v35, %v1304_v27 }
 0x2fa   : > { %1337 = vmax.xlane.f32.xlu0 %v1213_v7  ;;  %v1499_v54 = vmul.f32 1.442695, %v3698_v14 }
 0x2fb   : > { %1950 = vst.msk [vmem:[%s3166_s30 + $0xe8] sm:$0xff] %vm684_vm1, %v1886_v22  ;;  %v1495_v22 = vmul.f32 1.442695, %v3716_v38 }
 0x2fc   : > { %v1077_v39 = vpop.f32.mrf.mxu2  ;;  %2341 = vpow2.f32 %v1499_v54 }
 0x2fd   : > { %v3711_v20 = vadd.f32 %v2451_v48, %v1077_v39 }
 0x2fe   : > { %v2340_v60 = vpop.eup %2339 }
 0x2ff   : > { %v1790_v41 = vmul.f32 0.6931472, %v2340_v60  ;;  %v1147_v46 = vmax.f32 %v3711_v20, 0.0  ;;  %v1664_v51 = vpop.xlane.xlu2 %1663  ;;  %v1310_v39 = vpop.xlane.xlu1 %1309 }
 0x300   : > { %2343 = vlog2.f32 %v1664_v51 }
 0x301   : > { %v1887_v8 = vsub.f32 %v3421_v34, %v1790_v41  ;;  %v1214_v44 = vsel %vm1152_vm2, %v1147_v46, -inf  ;;  %v3730_v34 = vsub.f32 %v1130_v50, %v1306_v2  ;;  %2345 = vpow2.f32 %v1495_v22 }
 0x302   : > { %1339 = vmax.xlane.f32.xlu1 %v1214_v44  ;;  %v2342_v54 = vpop.eup %2341  ;;  %v3735_v41 = vsub.f32 %v1132_v1, %v1310_v39 }
 0x303   : > { %1951 = vst.msk [vmem:[%s3166_s30 + $0xf0] sm:$0xff] %vm684_vm1, %v1887_v8  ;;  %v1582_v42 = vsel %vm1152_vm2, %v2342_v54, 0.0  ;;  %v1497_v50 = vmul.f32 1.442695, %v3730_v34 }
 0x304   : > { %v1080_v7 = vpop.f32.mrf.mxu2  ;;  %v1501_v58 = vmul.f32 1.442695, %v3735_v41 }
 0x305   : > { %v3726_v4 = vadd.f32 %v2451_v48, %v1080_v7  ;;  %2347 = vpow2.f32 %v1497_v50 }
 0x306   : > { %v2344_v35 = vpop.eup %2343  ;;  %2349 = vpow2.f32 %v1501_v58 }
 0x307   : > { %v1792_v27 = vmul.f32 0.6931472, %v2344_v35  ;;  %v1148_v60 = vmax.f32 %v3726_v4, 0.0  ;;  %v1312_v2 = vpop.xlane.xlu2 %1311  ;;  %v2346_v22 = vpop.eup %2345 }
 0x308   : > { %v3757_v39 = vsub.f32 %v1133_v3, %v1312_v2  ;;  %v1580_v25 = vsel %vm1152_vm2, %v2346_v22, 0.0 }
 0x309   : > { %v1888_v51 = vsub.f32 %v3441_v61, %v1792_v27  ;;  %v1215_v8 = vsel %vm1152_vm2, %v1148_v60, -inf }
 0x30a   : > { %1341 = vmax.xlane.f32.xlu2 %v1215_v8  ;;  %1691 = vadd.xlane.f32.xlu1 %v1582_v42 }
 0x30b   : > { %1952 = vst.msk [vmem:[%s3166_s30 + $0xf8] sm:$0xff] %vm684_vm1, %v1888_v51  ;;  %v2348_v27 = vpop.eup %2347 }
 0x30c   : > { %v1083_v1 = vpop.f32.mrf.mxu2  ;;  %v2350_v3 = vpop.eup %2349  ;;  %v1581_v58 = vsel %vm1152_vm2, %v2348_v27, 0.0 }
 0x30d   : > { %v3748_v44 = vadd.f32 %v2451_v48, %v1083_v1  ;;  %v1314_v61 = vpop.xlane.xlu0 %1313  ;;  %v1583_v1 = vsel %vm1152_vm2, %v2350_v3, 0.0 }
 0x30e   : > { %v3752_v7 = vsub.f32 %v1134_v62, %v1314_v61  ;;  %v1503_v62 = vmul.f32 1.442695, %v3757_v39 }
 0x30f   : > { %v1149_v54 = vmax.f32 %v3748_v44, 0.0 }
 0x310   : > { %v1505_v35 = vmul.f32 1.442695, %v3752_v7 }
 0x311   : > { %v1216_v48 = vsel %vm1152_vm2, %v1149_v54, -inf }
 0x312   : > { %2351 = vpow2.f32 %v1505_v35  ;;  %1343 = vmax.xlane.f32.xlu0 %v1216_v48  ;;  %1687 = vadd.xlane.f32.xlu2 %v1580_v25 }
 0x315   : > { %v1316_v51 = vpop.xlane.xlu1 %1315  ;;  %v1666_v16 = vpop.xlane.xlu0 %1665 }
 0x316   : > { %v3769_v8 = vsub.f32 %v1135_v11, %v1316_v51  ;;  %2353 = vlog2.f32 %v1666_v16 }
 0x317   : > { %2355 = vpow2.f32 %v1503_v62 }
 0x318   : > { %v2352_v42 = vpop.eup %2351  ;;  %v1507_v50 = vmul.f32 1.442695, %v3769_v8 }
 0x319   : > { %v1585_v2 = vsel %vm1152_vm2, %v2352_v42, 0.0 }
 0x31a   : > { %2357 = vpow2.f32 %v1507_v50  ;;  %1689 = vadd.xlane.f32.xlu0 %v1581_v58  ;;  %1693 = vadd.xlane.f32.xlu2 %v1583_v1 }
 0x31b   : > { %1697 = vadd.xlane.f32.xlu1 %v1585_v2 }
 0x31c   : > { %v2354_v10 = vpop.eup %2353 }
 0x31d   : > { %v1794_v11 = vmul.f32 0.6931472, %v2354_v10  ;;  %v1318_v61 = vpop.xlane.xlu2 %1317  ;;  %v1668_v22 = vpop.xlane.xlu1 %1667 }
 0x31e   : > { %v2356_v35 = vpop.eup %2355  ;;  %v3780_v48 = vsub.f32 %v1136_v37, %v1318_v61  ;;  %2359 = vlog2.f32 %v1668_v22 }
 0x31f   : > { %v1889_v25 = vsub.f32 %v3475_v52, %v1794_v11  ;;  %v1584_v51 = vsel %vm1152_vm2, %v2356_v35, 0.0 }
 0x320   : > { %v2358_v62 = vpop.eup %2357  ;;  %v1509_v27 = vmul.f32 1.442695, %v3780_v48 }
 0x321   : > { %1953 = vst.msk [vmem:[%s3166_s30 + $0x100] sm:$0xff] %vm684_vm1, %v1889_v25  ;;  %v1586_v16 = vsel %vm1152_vm2, %v2358_v62, 0.0 }
 0x322   : > { %2361 = vpow2.f32 %v1509_v27  ;;  %1695 = vadd.xlane.f32.xlu0 %v1584_v51  ;;  %1699 = vadd.xlane.f32.xlu2 %v1586_v16 }
 0x324   : > { %v2360_v43 = vpop.eup %2359 }
 0x325   : > { %v1796_v37 = vmul.f32 0.6931472, %v2360_v43  ;;  %v1670_v3 = vpop.xlane.xlu2 %1669  ;;  %v1320_v42 = vpop.xlane.xlu0 %1319 }
 0x326   : > { %2363 = vlog2.f32 %v1670_v3  ;;  %v3792_v52 = vsub.f32 %v1137_v45, %v1320_v42 }
 0x327   : > { %v1890_v50 = vsub.f32 %v3494_v47, %v1796_v37 }
 0x328   : > { %v2362_v58 = vpop.eup %2361  ;;  %v1511_v1 = vmul.f32 1.442695, %v3792_v52 }
 0x329   : > { %1954 = vst.msk [vmem:[%s3166_s30 + $0x108] sm:$0xff] %vm684_vm1, %v1890_v50  ;;  %v1587_v2 = vsel %vm1152_vm2, %v2362_v58, 0.0 }
 0x32a   : > { %2365 = vpow2.f32 %v1511_v1  ;;  %1701 = vadd.xlane.f32.xlu0 %v1587_v2 }
 0x32c   : > { %v2364_v10 = vpop.eup %2363 }
 0x32d   : > { %v1798_v11 = vmul.f32 0.6931472, %v2364_v10  ;;  %v1322_v61 = vpop.xlane.xlu1 %1321  ;;  %v1672_v22 = vpop.xlane.xlu0 %1671 }
 0x32e   : > { %v3802_v36 = vsub.f32 %v1138_v53, %v1322_v61  ;;  %2367 = vlog2.f32 %v1672_v22 }
 0x32f   : > { %v1891_v47 = vsub.f32 %v3510_v21, %v1798_v11 }
 0x330   : > { %v2366_v45 = vpop.eup %2365  ;;  %v1513_v35 = vmul.f32 1.442695, %v3802_v36 }
 0x331   : > { %1955 = vst.msk [vmem:[%s3166_s30 + $0x110] sm:$0xff] %vm684_vm1, %v1891_v47  ;;  %v1588_v25 = vsel %vm1152_vm2, %v2366_v45, 0.0 }
 0x332   : > { %2369 = vpow2.f32 %v1513_v35  ;;  %1703 = vadd.xlane.f32.xlu1 %v1588_v25 }
 0x334   : > { %v2368_v62 = vpop.eup %2367 }
 0x335   : > { %v1800_v27 = vmul.f32 0.6931472, %v2368_v62  ;;  %v1324_v51 = vpop.xlane.xlu2 %1323  ;;  %v1674_v31 = vpop.xlane.xlu1 %1673 }
 0x336   : > { %v3812_v53 = vsub.f32 %v1139_v23, %v1324_v51  ;;  %2371 = vlog2.f32 %v1674_v31 }
 0x337   : > { %v1892_v21 = vsub.f32 %v3528_v6, %v1800_v27 }
 0x338   : > { %v2370_v16 = vpop.eup %2369  ;;  %v1515_v43 = vmul.f32 1.442695, %v3812_v53 }
 0x339   : > { %1956 = vst.msk [vmem:[%s3166_s30 + $0x118] sm:$0xff] %vm684_vm1, %v1892_v21  ;;  %v1589_v37 = vsel %vm1152_vm2, %v2370_v16, 0.0 }
 0x33a   : > { %2373 = vpow2.f32 %v1515_v43  ;;  %1705 = vadd.xlane.f32.xlu2 %v1589_v37 }
 0x33c   : > { %v2372_v3 = vpop.eup %2371 }
 0x33d   : > { %v1802_v42 = vmul.f32 0.6931472, %v2372_v3  ;;  %v1676_v50 = vpop.xlane.xlu2 %1675  ;;  %v1326_v55 = vpop.xlane.xlu0 %1325 }
 0x33e   : > { %2375 = vlog2.f32 %v1676_v50  ;;  %v3822_v23 = vsub.f32 %v1140_v33, %v1326_v55 }
 0x33f   : > { %v1893_v6 = vsub.f32 %v3546_v49, %v1802_v42 }
 0x340   : > { %v2374_v58 = vpop.eup %2373  ;;  %v1517_v1 = vmul.f32 1.442695, %v3822_v23 }
 0x341   : > { %1957 = vst.msk [vmem:[%s3166_s30 + $0x120] sm:$0xff] %vm684_vm1, %v1893_v6  ;;  %v1590_v2 = vsel %vm1152_vm2, %v2374_v58, 0.0 }
 0x342   : > { %2377 = vpow2.f32 %v1517_v1  ;;  %1707 = vadd.xlane.f32.xlu0 %v1590_v2 }
 0x344   : > { %v2376_v10 = vpop.eup %2375 }
 0x345   : > { %v1804_v11 = vmul.f32 0.6931472, %v2376_v10  ;;  %v1328_v61 = vpop.xlane.xlu1 %1327  ;;  %v1678_v22 = vpop.xlane.xlu0 %1677 }
 0x346   : > { %v3832_v0 = vsub.f32 %v1141_v26, %v1328_v61  ;;  %2379 = vlog2.f32 %v1678_v22 }
 0x347   : > { %v1894_v49 = vsub.f32 %v3564_v30, %v1804_v11 }
 0x348   : > { %v2378_v33 = vpop.eup %2377  ;;  %v1519_v47 = vmul.f32 1.442695, %v3832_v0 }
 0x349   : > { %1958 = vst.msk [vmem:[%s3166_s30 + $0x128] sm:$0xff] %vm684_vm1, %v1894_v49  ;;  %v1591_v45 = vsel %vm1152_vm2, %v2378_v33, 0.0 }
 0x34a   : > { %2381 = vpow2.f32 %v1519_v47  ;;  %1709 = vadd.xlane.f32.xlu1 %v1591_v45 }
 0x34c   : > { %v2380_v35 = vpop.eup %2379 }
 0x34d   : > { %v1806_v25 = vmul.f32 0.6931472, %v2380_v35  ;;  %v1330_v62 = vpop.xlane.xlu2 %1329  ;;  %v1680_v9 = vpop.xlane.xlu1 %1679 }
 0x34e   : > { %v3842_v26 = vsub.f32 %v1142_v57, %v1330_v62  ;;  %2383 = vlog2.f32 %v1680_v9 }
 0x34f   : > { %v1895_v30 = vsub.f32 %v3582_v32, %v1806_v25 }
 0x350   : > { %v2382_v27 = vpop.eup %2381  ;;  %v1521_v51 = vmul.f32 1.442695, %v3842_v26 }
 0x351   : > { %1959 = vst.msk [vmem:[%s3166_s30 + $0x130] sm:$0xff] %vm684_vm1, %v1895_v30  ;;  %v1592_v31 = vsel %vm1152_vm2, %v2382_v27, 0.0 }
 0x352   : > { %2385 = vpow2.f32 %v1521_v51  ;;  %1711 = vadd.xlane.f32.xlu2 %v1592_v31 }
 0x354   : > { %v2384_v21 = vpop.eup %2383 }
 0x355   : > { %v1808_v16 = vmul.f32 0.6931472, %v2384_v21  ;;  %v1682_v43 = vpop.xlane.xlu2 %1681  ;;  %v1332_v12 = vpop.xlane.xlu0 %1331 }
 0x356   : > { %2387 = vlog2.f32 %v1682_v43  ;;  %v3852_v57 = vsub.f32 %v1143_v40, %v1332_v12 }
 0x357   : > { %v1896_v32 = vsub.f32 %v3600_v24, %v1808_v16 }
 0x358   : > { %v2386_v37 = vpop.eup %2385  ;;  %v1523_v3 = vmul.f32 1.442695, %v3852_v57 }
 0x359   : > { %1960 = vst.msk [vmem:[%s3166_s30 + $0x138] sm:$0xff] %vm684_vm1, %v1896_v32  ;;  %v1593_v42 = vsel %vm1152_vm2, %v2386_v37, 0.0 }
 0x35a   : > { %2389 = vpow2.f32 %v1523_v3  ;;  %1713 = vadd.xlane.f32.xlu0 %v1593_v42 }
 0x35c   : > { %v2388_v50 = vpop.eup %2387 }
 0x35d   : > { %v1810_v55 = vmul.f32 0.6931472, %v2388_v50  ;;  %v1334_v6 = vpop.xlane.xlu1 %1333  ;;  %v1684_v58 = vpop.xlane.xlu0 %1683 }
 0x35e   : > { %v3862_v59 = vsub.f32 %v1144_v56, %v1334_v6  ;;  %2391 = vlog2.f32 %v1684_v58 }
 0x35f   : > { %v1897_v24 = vsub.f32 %v3618_v18, %v1810_v55 }
 0x360   : > { %v2390_v40 = vpop.eup %2389  ;;  %v1525_v1 = vmul.f32 1.442695, %v3862_v59 }
 0x361   : > { %1961 = vst.msk [vmem:[%s3166_s30 + $0x140] sm:$0xff] %vm684_vm1, %v1897_v24  ;;  %v1594_v2 = vsel %vm1152_vm2, %v2390_v40, 0.0 }
 0x362   : > { %2393 = vpow2.f32 %v1525_v1  ;;  %1715 = vadd.xlane.f32.xlu1 %v1594_v2 }
 0x364   : > { %v2392_v10 = vpop.eup %2391 }
 0x365   : > { %v1812_v11 = vmul.f32 0.6931472, %v2392_v10  ;;  %v1336_v61 = vpop.xlane.xlu2 %1335  ;;  %v1686_v63 = vpop.xlane.xlu1 %1685 }
 0x366   : > { %v3872_v56 = vsub.f32 %v1145_v5, %v1336_v61  ;;  %2395 = vlog2.f32 %v1686_v63 }
 0x367   : > { %v1898_v18 = vsub.f32 %v3636_v13, %v1812_v11 }
 0x368   : > { %v2394_v22 = vpop.eup %2393  ;;  %v1527_v49 = vmul.f32 1.442695, %v3872_v56 }
 0x369   : > { %1962 = vst.msk [vmem:[%s3166_s30 + $0x148] sm:$0xff] %vm684_vm1, %v1898_v18  ;;  %v1595_v33 = vsel %vm1152_vm2, %v2394_v22, 0.0 }
 0x36a   : > { %2397 = vpow2.f32 %v1527_v49  ;;  %1717 = vadd.xlane.f32.xlu2 %v1595_v33 }
 0x36c   : > { %v2396_v47 = vpop.eup %2395 }
 0x36d   : > { %v1814_v45 = vmul.f32 0.6931472, %v2396_v47  ;;  %v1338_v35 = vpop.xlane.xlu0 %1337 }
 0x36e   : > { %v3882_v19 = vsub.f32 %v1146_v28, %v1338_v35 }
 0x36f   : > { %v1899_v5 = vsub.f32 %v3654_v17, %v1814_v45 }
 0x370   : > { %v2398_v13 = vpop.eup %2397  ;;  %v1529_v25 = vmul.f32 1.442695, %v3882_v19 }
 0x371   : > { %1963 = vst.msk [vmem:[%s3166_s30 + $0x150] sm:$0xff] %vm684_vm1, %v1899_v5  ;;  %v1596_v62 = vsel %vm1152_vm2, %v2398_v13, 0.0 }
 0x372   : > { %2399 = vpow2.f32 %v1529_v25  ;;  %1719 = vadd.xlane.f32.xlu0 %v1596_v62 }
 0x375   : > { %v1340_v9 = vpop.xlane.xlu1 %1339 }
 0x376   : > { %v3892_v30 = vsub.f32 %v1147_v46, %v1340_v9 }
 0x378   : > { %v2400_v15 = vpop.eup %2399  ;;  %v1531_v28 = vmul.f32 1.442695, %v3892_v30 }
 0x379   : > { %v1597_v17 = vsel %vm1152_vm2, %v2400_v15, 0.0 }
 0x37a   : > { %2401 = vpow2.f32 %v1531_v28  ;;  %1721 = vadd.xlane.f32.xlu1 %v1597_v17 }
 0x37d   : > { %v1342_v27 = vpop.xlane.xlu2 %1341  ;;  %v1692_v51 = vpop.xlane.xlu1 %1691 }
 0x37e   : > { %v3899_v31 = vsub.f32 %v1148_v60, %v1342_v27  ;;  %2403 = vlog2.f32 %v1692_v51 }
 0x380   : > { %v2402_v21 = vpop.eup %2401  ;;  %v1533_v20 = vmul.f32 1.442695, %v3899_v31 }
 0x381   : > { %v1598_v46 = vsel %vm1152_vm2, %v2402_v21, 0.0 }
 0x382   : > { %2405 = vpow2.f32 %v1533_v20  ;;  %1723 = vadd.xlane.f32.xlu2 %v1598_v46 }
 0x384   : > { %v2404_v16 = vpop.eup %2403 }
 0x385   : > { %v1820_v43 = vmul.f32 0.6931472, %v2404_v16  ;;  %v1688_v12 = vpop.xlane.xlu2 %1687  ;;  %v1344_v32 = vpop.xlane.xlu0 %1343 }
 0x386   : > { %2407 = vlog2.f32 %v1688_v12  ;;  %v3906_v4 = vsub.f32 %v1149_v54, %v1344_v32 }
 0x387   : > { %v1902_v60 = vsub.f32 %v3698_v14, %v1820_v43 }
 0x388   : > { %v2406_v37 = vpop.eup %2405  ;;  %v1535_v3 = vmul.f32 1.442695, %v3906_v4 }
 0x389   : > { %1966 = vst.msk [vmem:[%s3166_s30 + $0x168] sm:$0xff] %vm684_vm1, %v1902_v60  ;;  %v1599_v42 = vsel %vm1152_vm2, %v2406_v37, 0.0 }
 0x38a   : > { %2409 = vpow2.f32 %v1535_v3  ;;  %1725 = vadd.xlane.f32.xlu0 %v1599_v42 }
 0x38c   : > { %v2408_v50 = vpop.eup %2407 }
 0x38d   : > { %v1816_v55 = vmul.f32 0.6931472, %v2408_v50  ;;  %v1694_v6 = vpop.xlane.xlu2 %1693  ;;  %v1690_v58 = vpop.xlane.xlu0 %1689 }
 0x38e   : > { %2411 = vlog2.f32 %v1694_v6  ;;  %v1698_v44 = vpop.xlane.xlu1 %1697 }
 0x38f   : > { %v1900_v54 = vsub.f32 %v3716_v38, %v1816_v55  ;;  %2413 = vlog2.f32 %v1698_v44 }
 0x390   : > { %v2410_v14 = vpop.eup %2409  ;;  %2415 = vlog2.f32 %v1690_v58 }
 0x391   : > { %1964 = vst.msk [vmem:[%s3166_s30 + $0x158] sm:$0xff] %vm684_vm1, %v1900_v54  ;;  %v1600_v24 = vsel %vm1152_vm2, %v2410_v14, 0.0 }
 0x392   : > { %1727 = vadd.xlane.f32.xlu1 %v1600_v24 }
 0x394   : > { %v2412_v40 = vpop.eup %2411 }
 0x395   : > { %v2414_v1 = vpop.eup %2413  ;;  %v1822_v2 = vmul.f32 0.6931472, %v2412_v40  ;;  %v1700_v10 = vpop.xlane.xlu2 %1699 }
 0x396   : > { %v1696_v11 = vpop.xlane.xlu0 %1695  ;;  %v2416_v61 = vpop.eup %2415  ;;  %v1826_v63 = vmul.f32 0.6931472, %v2414_v1  ;;  %2417 = vlog2.f32 %v1700_v10 }
 0x397   : > { %v1903_v38 = vsub.f32 %v3735_v41, %v1822_v2  ;;  %v1818_v18 = vmul.f32 0.6931472, %v2416_v61  ;;  %2419 = vlog2.f32 %v1696_v11 }
 0x398   : > { %v1905_v29 = vsub.f32 %v3752_v7, %v1826_v63 }
 0x399   : > { %1967 = vst.msk [vmem:[%s3166_s30 + $0x170] sm:$0xff] %vm684_vm1, %v1903_v38  ;;  %v1901_v22 = vsub.f32 %v3730_v34, %v1818_v18 }
 0x39a   : > { %1969 = vst.msk [vmem:[%s3166_s30 + $0x180] sm:$0xff] %vm684_vm1, %v1905_v29 }
 0x39b   : > { %1965 = vst.msk [vmem:[%s3166_s30 + $0x160] sm:$0xff] %vm684_vm1, %v1901_v22 }
 0x39c   : > { %v2418_v49 = vpop.eup %2417 }
 0x39d   : > { %v2420_v33 = vpop.eup %2419  ;;  %v1828_v47 = vmul.f32 0.6931472, %v2418_v49 }
 0x39e   : > { %v1702_v45 = vpop.xlane.xlu0 %1701  ;;  %v1824_v41 = vmul.f32 0.6931472, %v2420_v33 }
 0x39f   : > { %2421 = vlog2.f32 %v1702_v45  ;;  %v1906_v35 = vsub.f32 %v3769_v8, %v1828_v47 }
 0x3a0   : > { %v1904_v7 = vsub.f32 %v3757_v39, %v1824_v41 }
 0x3a1   : > { %1970 = vst.msk [vmem:[%s3166_s30 + $0x188] sm:$0xff] %vm684_vm1, %v1906_v35 }
 0x3a2   : > { %1968 = vst.msk [vmem:[%s3166_s30 + $0x178] sm:$0xff] %vm684_vm1, %v1904_v7 }
 0x3a5   : > { %v2422_v34 = vpop.eup %2421  ;;  %v1704_v13 = vpop.xlane.xlu1 %1703 }
 0x3a6   : > { %v1830_v5 = vmul.f32 0.6931472, %v2422_v34  ;;  %2423 = vlog2.f32 %v1704_v13 }
 0x3a8   : > { %v1907_v25 = vsub.f32 %v3780_v48, %v1830_v5 }
 0x3aa   : > { %1971 = vst.msk [vmem:[%s3166_s30 + $0x190] sm:$0xff] %vm684_vm1, %v1907_v25 }
 0x3ac   : > { %v2424_v62 = vpop.eup %2423 }
 0x3ad   : > { %v1832_v9 = vmul.f32 0.6931472, %v2424_v62  ;;  %v1706_v15 = vpop.xlane.xlu2 %1705 }
 0x3ae   : > { %2425 = vlog2.f32 %v1706_v15 }
 0x3af   : > { %v1908_v39 = vsub.f32 %v3792_v52, %v1832_v9 }
 0x3b1   : > { %1972 = vst.msk [vmem:[%s3166_s30 + $0x198] sm:$0xff] %vm684_vm1, %v1908_v39 }
 0x3b4   : > { %v2426_v8 = vpop.eup %2425 }
 0x3b5   : > { %v1834_v28 = vmul.f32 0.6931472, %v2426_v8  ;;  %v1708_v17 = vpop.xlane.xlu0 %1707 }
 0x3b6   : > { %2427 = vlog2.f32 %v1708_v17 }
 0x3b7   : > { %v1909_v27 = vsub.f32 %v3802_v36, %v1834_v28 }
 0x3b9   : > { %1973 = vst.msk [vmem:[%s3166_s30 + $0x1a0] sm:$0xff] %vm684_vm1, %v1909_v27 }
 0x3bc   : > { %v2428_v48 = vpop.eup %2427 }
 0x3bd   : > { %v1836_v51 = vmul.f32 0.6931472, %v2428_v48  ;;  %v1710_v21 = vpop.xlane.xlu1 %1709 }
 0x3be   : > { %2429 = vlog2.f32 %v1710_v21 }
 0x3bf   : > { %v1910_v20 = vsub.f32 %v3812_v53, %v1836_v51 }
 0x3c1   : > { %1974 = vst.msk [vmem:[%s3166_s30 + $0x1a8] sm:$0xff] %vm684_vm1, %v1910_v20 }
 0x3c4   : > { %v2430_v52 = vpop.eup %2429 }
 0x3c5   : > { %v1838_v46 = vmul.f32 0.6931472, %v2430_v52  ;;  %v1712_v16 = vpop.xlane.xlu2 %1711 }
 0x3c6   : > { %2431 = vlog2.f32 %v1712_v16 }
 0x3c7   : > { %v1911_v43 = vsub.f32 %v3822_v23, %v1838_v46 }
 0x3c9   : > { %1975 = vst.msk [vmem:[%s3166_s30 + $0x1b0] sm:$0xff] %vm684_vm1, %v1911_v43 }
 0x3cc   : > { %v2432_v36 = vpop.eup %2431 }
 0x3cd   : > { %v1840_v12 = vmul.f32 0.6931472, %v2432_v36  ;;  %v1714_v32 = vpop.xlane.xlu0 %1713 }
 0x3ce   : > { %2433 = vlog2.f32 %v1714_v32 }
 0x3cf   : > { %v1912_v60 = vsub.f32 %v3832_v0, %v1840_v12 }
 0x3d1   : > { %1976 = vst.msk [vmem:[%s3166_s30 + $0x1b8] sm:$0xff] %vm684_vm1, %v1912_v60 }
 0x3d4   : > { %v2434_v53 = vpop.eup %2433 }
 0x3d5   : > { %v1842_v37 = vmul.f32 0.6931472, %v2434_v53  ;;  %v1716_v3 = vpop.xlane.xlu1 %1715 }
 0x3d6   : > { %2435 = vlog2.f32 %v1716_v3 }
 0x3d7   : > { %v1913_v42 = vsub.f32 %v3842_v26, %v1842_v37 }
 0x3d9   : > { %1977 = vst.msk [vmem:[%s3166_s30 + $0x1c0] sm:$0xff] %vm684_vm1, %v1913_v42 }
 0x3dc   : > { %v2436_v23 = vpop.eup %2435 }
 0x3dd   : > { %v1844_v50 = vmul.f32 0.6931472, %v2436_v23  ;;  %v1718_v55 = vpop.xlane.xlu2 %1717 }
 0x3de   : > { %2437 = vlog2.f32 %v1718_v55 }
 0x3df   : > { %v1914_v6 = vsub.f32 %v3852_v57, %v1844_v50 }
 0x3e1   : > { %1978 = vst.msk [vmem:[%s3166_s30 + $0x1c8] sm:$0xff] %vm684_vm1, %v1914_v6 }
 0x3e4   : > { %v2438_v0 = vpop.eup %2437 }
 0x3e5   : > { %v1846_v58 = vmul.f32 0.6931472, %v2438_v0  ;;  %v1720_v44 = vpop.xlane.xlu0 %1719 }
 0x3e6   : > { %2439 = vlog2.f32 %v1720_v44 }
 0x3e7   : > { %v1915_v54 = vsub.f32 %v3862_v59, %v1846_v58 }
 0x3e9   : > { %1979 = vst.msk [vmem:[%s3166_s30 + $0x1d0] sm:$0xff] %vm684_vm1, %v1915_v54 }
 0x3ec   : > { %v2440_v26 = vpop.eup %2439 }
 0x3ed   : > { %v1848_v14 = vmul.f32 0.6931472, %v2440_v26  ;;  %v1722_v24 = vpop.xlane.xlu1 %1721 }
 0x3ee   : > { %2441 = vlog2.f32 %v1722_v24 }
 0x3ef   : > { %v1916_v40 = vsub.f32 %v3872_v56, %v1848_v14 }
 0x3f1   : > { %1980 = vst.msk [vmem:[%s3166_s30 + $0x1d8] sm:$0xff] %vm684_vm1, %v1916_v40 }
 0x3f4   : > { %v2442_v57 = vpop.eup %2441 }
 0x3f5   : > { %v1850_v1 = vmul.f32 0.6931472, %v2442_v57  ;;  %v1724_v2 = vpop.xlane.xlu2 %1723 }
 0x3f6   : > { %2443 = vlog2.f32 %v1724_v2 }
 0x3f7   : > { %v1917_v10 = vsub.f32 %v3882_v19, %v1850_v1 }
 0x3f9   : > { %1981 = vst.msk [vmem:[%s3166_s30 + $0x1e0] sm:$0xff] %vm684_vm1, %v1917_v10 }
 0x3fc   : > { %v2444_v59 = vpop.eup %2443 }
 0x3fd   : > { %v1852_v11 = vmul.f32 0.6931472, %v2444_v59  ;;  %v1726_v61 = vpop.xlane.xlu0 %1725 }
 0x3fe   : > { %2445 = vlog2.f32 %v1726_v61 }
 0x3ff   : > { %v1918_v63 = vsub.f32 %v3892_v30, %v1852_v11 }
 0x401   : > { %1982 = vst.msk [vmem:[%s3166_s30 + $0x1e8] sm:$0xff] %vm684_vm1, %v1918_v63 }
 0x404   : > { %v2446_v56 = vpop.eup %2445 }
 0x405   : > { %v1854_v38 = vmul.f32 0.6931472, %v2446_v56  ;;  %v1728_v18 = vpop.xlane.xlu1 %1727 }
 0x406   : > { %2447 = vlog2.f32 %v1728_v18 }
 0x407   : > { %v1919_v29 = vsub.f32 %v3899_v31, %v1854_v38 }
 0x409   : > { %1983 = vst.msk [vmem:[%s3166_s30 + $0x1f0] sm:$0xff] %vm684_vm1, %v1919_v29 }
 0x40c   : > { %v2448_v19 = vpop.eup %2447 }
 0x40d   : > { %v1856_v22 = vmul.f32 0.6931472, %v2448_v19 }
 0x40f   : > { %v1920_v49 = vsub.f32 %v3906_v4, %v1856_v22 }
 0x411   : > { %1984 = vst.msk [vmem:[%s3166_s30 + $0x1f8] sm:$0xff] %vm684_vm1, %v1920_v49 }
 0x412 PF: > { %s12_s9 = sadd.s32 1, %s2458_s9  }
 0x413   : > { %p9_p4 = scmp.ge.s32.totalorder %s12_s9, 4  }
 0x415   :  { %11 = sbr.rel (!%p9_p4) target bundleno = 1 (0x1), region = 58 }

</bundles_post_ra>
